<compile_context>
chip_gen: v5e
topology: v5e:2x2
jax: 0.10.0
libtpu: 0.0.40
codegen_flags: <defaults>
</compile_context>

<pallas_src>
import jax
import jax.numpy as jnp
from jax.experimental import pallas as pl
from jax.experimental.pallas import tpu as pltpu


# ----------------------------------------------------------------------------- kernels
def _acc_banded(xpad, bw_ref, D, H, h_base, acc):
    """Accumulate the 9 (kd, kh) banded matmuls.

    xpad   : (D+2, >=h_base+H+2, K) f32 value, zero rows at padded D/H positions.
    bw_ref : (9, K, Nc) bf16 ref of block-banded weights (W taps + W padding folded in).
    """
    K = xpad.shape[-1]
    i = 0
    for kd in range(3):
        for kh in range(3):
            slab = xpad[kd:kd + D, h_base + kh:h_base + kh + H, :]
            slab = slab.reshape(D * H, K).astype(jnp.bfloat16)
            acc = acc + jnp.dot(slab, bw_ref[i], preferred_element_type=jnp.float32)
            i += 1
    return acc


def _conv1_kernel(xa_ref, xb_ref, bwa_ref, bwb_ref, b_ref, y_ref, s_ref, ss_ref):
    # xa_ref : (1, D+2, H+2, W*Ca) bf16  upsampled input, (D,H)-padded, (W,C)-flattened
    # xb_ref : (1, D+2, H+2, W*Cb) bf16  skip connection, same layout
    # bwa/bwb: (9, W*Ca, W*Cout) / (9, W*Cb, W*Cout) bf16 banded weights (split-K concat)
    # b_ref  : (1, W*Cout) f32 bias (channel bias tiled over W)
    # y_ref  : (1, D*H, W*Cout) bf16 pre-BN conv output
    # s_ref/ss_ref: (1, 1, W*Cout) f32 per-step partial sum / sum-of-squares
    Dp, Hp = xa_ref.shape[1], xa_ref.shape[2]
    D, H = Dp - 2, Hp - 2
    wcout = y_ref.shape[-1]
    xa = xa_ref[0].astype(jnp.float32)
    xb = xb_ref[0].astype(jnp.float32)
    acc = jnp.zeros((D * H, wcout), jnp.float32)
    acc = _acc_banded(xa, bwa_ref, D, H, 0, acc)       # x channels
    acc = _acc_banded(xb, bwb_ref, D, H, 0, acc)       # skip channels (fused concat)
    y = acc + b_ref[...]
    y_ref[0] = y.astype(y_ref.dtype)
    s_ref[0] = jnp.sum(y, axis=0, keepdims=True)
    ss_ref[0] = jnp.sum(y * y, axis=0, keepdims=True)


def _conv2_kernel(y1_ref, sc_ref, sh_ref, bw_ref, b_ref, y_ref, s_ref, ss_ref, pad_ref):
    # y1_ref : (1, D, H, W*C) bf16  UNPADDED layer-1 pre-BN output
    # sc/sh  : (1, W*C) f32         fused BatchNorm1 scale / shift (tiled over W)
    # bw_ref : (9, W*C, W*Cout) bf16 banded weights; b_ref: (1, W*Cout) f32
    # pad_ref: VMEM scratch (D+2, H+16, W*C) f32  (activation stored at H offset 8 so the
    #          interior store stays sublane-aligned; reads use offsets 7/8/9)
    D, H = y1_ref.shape[1], y1_ref.shape[2]
    wc = y1_ref.shape[3]
    wcout = y_ref.shape[-1]
    sc = sc_ref[...].reshape(1, 1, wc)
    sh = sh_ref[...].reshape(1, 1, wc)
    a1 = jnp.maximum(y1_ref[0].astype(jnp.float32) * sc + sh, 0.0)   # BN1 + ReLU1 prologue
    pad_ref[...] = jnp.zeros_like(pad_ref)
    pad_ref[1:D + 1, 8:8 + H, :] = a1
    acc = jnp.zeros((D * H, wcout), jnp.float32)
    acc = _acc_banded(pad_ref[...], bw_ref, D, H, 7, acc)
    y = acc + b_ref[...]
    y_ref[0] = y.astype(y_ref.dtype)
    s_ref[0] = jnp.sum(y, axis=0, keepdims=True)
    ss_ref[0] = jnp.sum(y * y, axis=0, keepdims=True)


def _affine_relu_kernel(x_ref, sc_ref, sh_ref, o_ref):
    # x_ref: (1, M, L) bf16 (lane-packed when L == 128); sc/sh: (1, L) f32; o_ref f32.
    x = x_ref[0].astype(jnp.float32)
    o_ref[0] = jnp.maximum(x * sc_ref[...] + sh_ref[...], 0.0).astype(o_ref.dtype)


# ----------------------------------------------------------------------------- wrappers
def _banded_weights(w_dhwio, W):
    """(3,3,3,Cin,Cout) conv weights -> (9, W*Cin, W*Cout) block-banded matrices.

    B[kd*3+kh, v*Cin+c, w*Cout+o] = w[kd, kh, v-w+1, c, o] if 0 <= v-w+1 < 3 else 0,
    which folds the W-direction taps *and* the 'SAME' W zero padding into the matmul."""
    kD, kH, kW, Cin, Cout = w_dhwio.shape
    v = jnp.arange(W)[:, None]
    wo = jnp.arange(W)[None, :]
    kw = v - wo + 1                                     # (W, W)
    valid = (kw >= 0) & (kw < kW)
    kw_c = jnp.clip(kw, 0, kW - 1)
    wk = w_dhwio[:, :, kw_c]                            # (3, 3, W, W, Cin, Cout)
    wk = jnp.where(valid[None, None, :, :, None, None], wk, 0.0)
    wk = jnp.transpose(wk, (0, 1, 2, 4, 3, 5))          # (3, 3, W, Cin, W, Cout)
    return wk.reshape(kD * kH, W * Cin, W * Cout)


def _conv1_call(xa_p, xb_p, bwa, bwb, bias):
    N, Dp, Hp, WCa = xa_p.shape
    WCb = xb_p.shape[-1]
    WCout = bwa.shape[-1]
    D, H = Dp - 2, Hp - 2
    return pl.pallas_call(
        _conv1_kernel,
        out_shape=(jax.ShapeDtypeStruct((N, D * H, WCout), jnp.bfloat16),
                   jax.ShapeDtypeStruct((N, 1, WCout), jnp.float32),
                   jax.ShapeDtypeStruct((N, 1, WCout), jnp.float32)),
        grid_spec=pltpu.PrefetchScalarGridSpec(
            num_scalar_prefetch=0,
            grid=(N,),
            in_specs=[
                pl.BlockSpec((1, Dp, Hp, WCa), lambda n: (n, 0, 0, 0)),
                pl.BlockSpec((1, Dp, Hp, WCb), lambda n: (n, 0, 0, 0)),
                pl.BlockSpec(bwa.shape, lambda n: (0, 0, 0)),
                pl.BlockSpec(bwb.shape, lambda n: (0, 0, 0)),
                pl.BlockSpec((1, WCout), lambda n: (0, 0)),
            ],
            out_specs=(
                pl.BlockSpec((1, D * H, WCout), lambda n: (n, 0, 0)),
                pl.BlockSpec((1, 1, WCout), lambda n: (n, 0, 0)),
                pl.BlockSpec((1, 1, WCout), lambda n: (n, 0, 0)),
            )),
        compiler_params=pltpu.CompilerParams(dimension_semantics=("parallel",)),
    )(xa_p, xb_p, bwa, bwb, bias)


def _conv2_call(y1_sp, sc, sh, bw, bias):
    N, D, H, WC = y1_sp.shape
    WCout = bw.shape[-1]
    return pl.pallas_call(
        _conv2_kernel,
        out_shape=(jax.ShapeDtypeStruct((N, D * H, WCout), jnp.bfloat16),
                   jax.ShapeDtypeStruct((N, 1, WCout), jnp.float32),
                   jax.ShapeDtypeStruct((N, 1, WCout), jnp.float32)),
        grid_spec=pltpu.PrefetchScalarGridSpec(
            num_scalar_prefetch=0,
            grid=(N,),
            in_specs=[
                pl.BlockSpec((1, D, H, WC), lambda n: (n, 0, 0, 0)),
                pl.BlockSpec((1, WC), lambda n: (0, 0)),
                pl.BlockSpec((1, WC), lambda n: (0, 0)),
                pl.BlockSpec(bw.shape, lambda n: (0, 0, 0)),
                pl.BlockSpec((1, WCout), lambda n: (0, 0)),
            ],
            out_specs=(
                pl.BlockSpec((1, D * H, WCout), lambda n: (n, 0, 0)),
                pl.BlockSpec((1, 1, WCout), lambda n: (n, 0, 0)),
                pl.BlockSpec((1, 1, WCout), lambda n: (n, 0, 0)),
            ),
            scratch_shapes=[pltpu.VMEM((D + 2, H + 16, WC), jnp.float32)]),
        compiler_params=pltpu.CompilerParams(dimension_semantics=("parallel",)),
    )(y1_sp, sc, sh, bw, bias)


def _affine_relu_call(y_flat, scale, shift):
    """max(y*scale + shift, 0) with per-channel scale/shift on (N, DHW, C); returns f32."""
    N, DHW, C = y_flat.shape
    if 128 % C == 0 and (DHW * C) % 128 == 0:
        pack = 128 // C                       # lane-pack -> dense (unmasked) loads/stores
        M = (DHW * C) // 128
        x = y_flat.reshape(N, M, 128)
        s = jnp.tile(scale, pack).reshape(1, 128).astype(jnp.float32)
        t = jnp.tile(shift, pack).reshape(1, 128).astype(jnp.float32)
    else:
        x = y_flat
        s = scale.reshape(1, C).astype(jnp.float32)
        t = shift.reshape(1, C).astype(jnp.float32)
    M, L = x.shape[1], x.shape[2]
    out = pl.pallas_call(
        _affine_relu_kernel,
        out_shape=jax.ShapeDtypeStruct((N, M, L), jnp.float32),
        grid_spec=pltpu.PrefetchScalarGridSpec(
            num_scalar_prefetch=0,
            grid=(N,),
            in_specs=[
                pl.BlockSpec((1, M, L), lambda n: (n, 0, 0)),
                pl.BlockSpec((1, L), lambda n: (0, 0)),
                pl.BlockSpec((1, L), lambda n: (0, 0)),
            ],
            out_specs=pl.BlockSpec((1, M, L), lambda n: (n, 0, 0))),
        compiler_params=pltpu.CompilerParams(dimension_semantics=("parallel",)),
    )(x, s, t)
    return out.reshape(N, DHW, C)


def _bn_affine(s_partial, ss_partial, gamma, beta, count, W, C, eps=1e-5):
    """Training-mode BN affine (biased batch variance) from per-step partial stats."""
    s = jnp.sum(s_partial, axis=(0, 1)).reshape(W, C).sum(axis=0)
    ss = jnp.sum(ss_partial, axis=(0, 1)).reshape(W, C).sum(axis=0)
    mean = s / count
    var = ss / count - mean * mean
    scale = gamma / jnp.sqrt(var + eps)
    shift = beta - mean * scale
    return scale, shift


# ----------------------------------------------------------------------------- glue ops
def trilinear_upsample_2x(x):
    """nn.Upsample(scale_factor=2, mode='trilinear', align_corners=False) on NDHWC,
    via static slices + fixed 0.25/0.75 weights (no gathers)."""
    for axis in (1, 2, 3):
        n = x.shape[axis]
        prev = jnp.concatenate(
            [jax.lax.slice_in_dim(x, 0, 1, axis=axis),
             jax.lax.slice_in_dim(x, 0, n - 1, axis=axis)], axis=axis)   # x[max(i-1,0)]
        nxt = jnp.concatenate(
            [jax.lax.slice_in_dim(x, 1, n, axis=axis),
             jax.lax.slice_in_dim(x, n - 1, n, axis=axis)], axis=axis)   # x[min(i+1,n-1)]
        even = 0.75 * x + 0.25 * prev
        odd = 0.75 * x + 0.25 * nxt
        y = jnp.stack([even, odd], axis=axis + 1)
        shp = list(x.shape)
        shp[axis] = 2 * n
        x = y.reshape(shp)
    return x


def decoder_block(x_ncdhw, skip_ncdhw, params, eps=1e-5):
    x = jnp.transpose(x_ncdhw, (0, 2, 3, 4, 1))      # NCDHW -> NDHWC
    skip = jnp.transpose(skip_ncdhw, (0, 2, 3, 4, 1))

    x = trilinear_upsample_2x(x)
    if x.shape[1:4] != skip.shape[1:4]:
        dD = skip.shape[1] - x.shape[1]
        dH = skip.shape[2] - x.shape[2]
        dW = skip.shape[3] - x.shape[3]
        x = jnp.pad(x, ((0, 0),
                        (dD // 2, dD - dD // 2),
                        (dH // 2, dH - dH // 2),
                        (dW // 2, dW - dW // 2),
                        (0, 0)))

    N, D, H, W, Ca = x.shape
    Cb = skip.shape[-1]
    Cout = params["w1"].shape[-1]
    DHW = D * H * W
    count = float(N * DHW)

    # (D,H) zero-padding + (W,C) flattening; W taps/padding live in the banded weights.
    def dh_pad_flat(t):
        t = jnp.pad(t, ((0, 0), (1, 1), (1, 1), (0, 0), (0, 0)))
        return t.reshape(N, D + 2, H + 2, W * t.shape[-1]).astype(jnp.bfloat16)

    xa_p = dh_pad_flat(x)
    xb_p = dh_pad_flat(skip)

    bwa = _banded_weights(params["w1"][:, :, :, :Ca, :], W).astype(jnp.bfloat16)
    bwb = _banded_weights(params["w1"][:, :, :, Ca:, :], W).astype(jnp.bfloat16)
    bw2 = _banded_weights(params["w2"], W).astype(jnp.bfloat16)
    b1f = jnp.tile(params["b1"], W).reshape(1, W * Cout).astype(jnp.float32)
    b2f = jnp.tile(params["b2"], W).reshape(1, W * Cout).astype(jnp.float32)

    # conv1 (channel concat fused via split-K); BN1 stats come back as per-step partials.
    y1, s1, ss1 = _conv1_call(xa_p, xb_p, bwa, bwb, b1f)
    scale1, shift1 = _bn_affine(s1, ss1, params["g1"], params["be1"], count, W, Cout, eps)

    # conv2 with BN1 + ReLU1 fused into its prologue.
    y1_sp = y1.reshape(N, D, H, W * Cout)                       # free row-major reshape
    sc1 = jnp.tile(scale1, W).reshape(1, W * Cout).astype(jnp.float32)
    sh1 = jnp.tile(shift1, W).reshape(1, W * Cout).astype(jnp.float32)
    y2, s2, ss2 = _conv2_call(y1_sp, sc1, sh1, bw2, b2f)
    scale2, shift2 = _bn_affine(s2, ss2, params["g2"], params["be2"], count, W, Cout, eps)

    # final BN2 + ReLU2 (lane-packed elementwise kernel), back to NCDHW.
    out = _affine_relu_call(y2.reshape(N, DHW, Cout), scale2, shift2)
    out = out.reshape(N, D, H, W, Cout)
    return jnp.transpose(out, (0, 4, 1, 2, 3))


# ----------------------------------------------------------------------------- reference
def _upsample_ref(x):
    # gather-based reference (independent of the static-slice implementation above)
    for axis in (1, 2, 3):
        in_size = x.shape[axis]
        out_size = in_size * 2
        src = (jnp.arange(out_size, dtype=jnp.float32) + 0.5) / 2.0 - 0.5
        src = jnp.maximum(src, 0.0)
        i0 = jnp.minimum(jnp.floor(src).astype(jnp.int32), in_size - 1)
        i1 = jnp.minimum(i0 + 1, in_size - 1)
        w1 = src - i0.astype(jnp.float32)
        shape = [1] * x.ndim
        shape[axis] = out_size
        w1 = w1.reshape(shape)
        x = jnp.take(x, i0, axis=axis) * (1.0 - w1) + jnp.take(x, i1, axis=axis) * w1
    return x


def reference(x_ncdhw, skip_ncdhw, params, eps=1e-5):
    x = jnp.transpose(x_ncdhw, (0, 2, 3, 4, 1))
    skip = jnp.transpose(skip_ncdhw, (0, 2, 3, 4, 1))
    x = _upsample_ref(x)
    if x.shape[1:4] != skip.shape[1:4]:
        dD = skip.shape[1] - x.shape[1]
        dH = skip.shape[2] - x.shape[2]
        dW = skip.shape[3] - x.shape[3]
        x = jnp.pad(x, ((0, 0), (dD // 2, dD - dD // 2),
                        (dH // 2, dH - dH // 2), (dW // 2, dW - dW // 2), (0, 0)))
    x = jnp.concatenate([x, skip], axis=-1)

    def conv_bn_relu(x, w, b, g, be):
        y = jax.lax.conv_general_dilated(
            x, w, (1, 1, 1), 'SAME',
            dimension_numbers=('NDHWC', 'DHWIO', 'NDHWC'),
            precision=jax.lax.Precision.HIGHEST) + b
        mean = y.mean(axis=(0, 1, 2, 3))
        var = y.var(axis=(0, 1, 2, 3))            # biased (training-mode BN)
        return jnp.maximum((y - mean) / jnp.sqrt(var + eps) * g + be, 0.0)

    x = conv_bn_relu(x, params["w1"], params["b1"], params["g1"], params["be1"])
    x = conv_bn_relu(x, params["w2"], params["b2"], params["g2"], params["be2"])
    return jnp.transpose(x, (0, 4, 1, 2, 3))


# ----------------------------------------------------------------------------- main
if __name__ == "__main__":
    key = jax.random.PRNGKey(0)
    in_ch, skip_ch, out_ch = 4, 4, 8
    N, D0, H0, W0 = 2, 4, 4, 4
    ks = jax.random.split(key, 10)

    x = jax.random.normal(ks[0], (N, in_ch, D0, H0, W0), jnp.float32)
    skip = jax.random.normal(ks[1], (N, skip_ch, 2 * D0, 2 * H0, 2 * W0), jnp.float32)

    cin = in_ch + skip_ch
    # Deterministic synthetic parameters (conv weights in DHWIO layout).
    params = dict(
        w1=0.1 * jax.random.normal(ks[2], (3, 3, 3, cin, out_ch), jnp.float32),
        b1=0.1 * jax.random.normal(ks[3], (out_ch,), jnp.float32),
        g1=1.0 + 0.1 * jax.random.normal(ks[4], (out_ch,), jnp.float32),
        be1=0.1 * jax.random.normal(ks[5], (out_ch,), jnp.float32),
        w2=0.1 * jax.random.normal(ks[6], (3, 3, 3, out_ch, out_ch), jnp.float32),
        b2=0.1 * jax.random.normal(ks[7], (out_ch,), jnp.float32),
        g2=1.0 + 0.1 * jax.random.normal(ks[8], (out_ch,), jnp.float32),
        be2=0.1 * jax.random.normal(ks[9], (out_ch,), jnp.float32),
    )

    out = jax.block_until_ready(decoder_block(x, skip, params))
    ref = jax.block_until_ready(reference(x, skip, params))

    assert out.shape == (N, out_ch, 2 * D0, 2 * H0, 2 * W0), out.shape
    err = float(jnp.max(jnp.abs(out - ref)))
    # Tolerance accounts for bf16 activations/weights on the MXU (f32 accumulation);
    # the f32 reference uses HIGHEST-precision convolutions.
    if err < 5e-2:
        print("KERNEL_OK")
    else:
        print(f"MISMATCH max_abs_err={err}")
</pallas_src>

<mosaic_0001>
module attributes {stable_mosaic.version = 11 : i64} {
  func.func @_conv1_kernel(%arg0: i32, %arg1: memref<1x10x10x32xbf16, #tpu.memory_space<vmem>>, %arg2: memref<1x10x10x32xbf16, #tpu.memory_space<vmem>>, %arg3: memref<9x32x64xbf16, #tpu.memory_space<vmem>>, %arg4: memref<9x32x64xbf16, #tpu.memory_space<vmem>>, %arg5: memref<1x64xf32, #tpu.memory_space<vmem>>, %arg6: memref<1x64x64xbf16, #tpu.memory_space<vmem>>, %arg7: memref<1x1x64xf32, #tpu.memory_space<vmem>>, %arg8: memref<1x1x64xf32, #tpu.memory_space<vmem>>) attributes {dimension_semantics = [#tpu.dimension_semantics<parallel>], iteration_bounds = array<i64: 2>, scalar_prefetch = 0 : i64, scratch_operands = 0 : i64, tpu.core_type = #tpu.core_type<tc>, window_params = [{transform_indices = @transform_0, window_bounds = array<i64: 1, 10, 10, 32>}, {transform_indices = @transform_1, window_bounds = array<i64: 1, 10, 10, 32>}, {pipeline_mode = #tpu.pipeline_mode<synchronous>, transform_indices = @transform_2, window_bounds = array<i64: 9, 32, 64>}, {pipeline_mode = #tpu.pipeline_mode<synchronous>, transform_indices = @transform_3, window_bounds = array<i64: 9, 32, 64>}, {pipeline_mode = #tpu.pipeline_mode<synchronous>, transform_indices = @transform_4, window_bounds = array<i64: 1, 64>}, {transform_indices = @transform_5, window_bounds = array<i64: 1, 64, 64>}, {transform_indices = @transform_6, window_bounds = array<i64: 1, 1, 64>}, {transform_indices = @transform_7, window_bounds = array<i64: 1, 1, 64>}]} {
    %c0 = arith.constant 0 : index
    %c0_0 = arith.constant 0 : index
    %c0_1 = arith.constant 0 : index
    %c0_2 = arith.constant 0 : index
    %0 = vector.load %arg1[%c0, %c0_0, %c0_1, %c0_2] : memref<1x10x10x32xbf16, #tpu.memory_space<vmem>>, vector<1x10x10x32xbf16>
    %1 = vector.shape_cast %0 : vector<1x10x10x32xbf16> to vector<10x10x32xbf16>
    %2 = arith.extf %1 : vector<10x10x32xbf16> to vector<10x10x32xf32>
    %c0_3 = arith.constant 0 : index
    %c0_4 = arith.constant 0 : index
    %c0_5 = arith.constant 0 : index
    %c0_6 = arith.constant 0 : index
    %3 = vector.load %arg2[%c0_3, %c0_4, %c0_5, %c0_6] : memref<1x10x10x32xbf16, #tpu.memory_space<vmem>>, vector<1x10x10x32xbf16>
    %4 = vector.shape_cast %3 : vector<1x10x10x32xbf16> to vector<10x10x32xbf16>
    %5 = arith.extf %4 : vector<10x10x32xbf16> to vector<10x10x32xf32>
    %cst = arith.constant 0.000000e+00 : f32
    %6 = vector.broadcast %cst : f32 to vector<64x64xf32>
    %7 = vector.extract_strided_slice %2 {offsets = [0, 0, 0], sizes = [8, 8, 32], strides = [1, 1, 1]} : vector<10x10x32xf32> to vector<8x8x32xf32>
    %8 = vector.shape_cast %7 : vector<8x8x32xf32> to vector<64x32xf32>
    %9 = arith.truncf %8 : vector<64x32xf32> to vector<64x32xbf16>
    %c0_7 = arith.constant 0 : index
    %c0_8 = arith.constant 0 : index
    %c0_9 = arith.constant 0 : index
    %10 = vector.load %arg3[%c0_7, %c0_8, %c0_9] : memref<9x32x64xbf16, #tpu.memory_space<vmem>>, vector<1x32x64xbf16>
    %11 = vector.shape_cast %10 : vector<1x32x64xbf16> to vector<32x64xbf16>
    %cst_10 = arith.constant dense<0.000000e+00> : vector<64x64xf32>
    %12 = tpu.matmul %9, %11, %cst_10 {dimension_numbers = #tpu.dot_dimension_numbers<[1], [0], [0], [1], [0, 0, 1, 1], [], []>} : vector<64x32xbf16>, vector<32x64xbf16>, vector<64x64xf32> -> vector<64x64xf32>
    %13 = arith.addf %6, %12 : vector<64x64xf32>
    %14 = vector.extract_strided_slice %2 {offsets = [0, 1, 0], sizes = [8, 8, 32], strides = [1, 1, 1]} : vector<10x10x32xf32> to vector<8x8x32xf32>
    %15 = vector.shape_cast %14 : vector<8x8x32xf32> to vector<64x32xf32>
    %16 = arith.truncf %15 : vector<64x32xf32> to vector<64x32xbf16>
    %c1 = arith.constant 1 : index
    %c0_11 = arith.constant 0 : index
    %c0_12 = arith.constant 0 : index
    %17 = vector.load %arg3[%c1, %c0_11, %c0_12] : memref<9x32x64xbf16, #tpu.memory_space<vmem>>, vector<1x32x64xbf16>
    %18 = vector.shape_cast %17 : vector<1x32x64xbf16> to vector<32x64xbf16>
    %cst_13 = arith.constant dense<0.000000e+00> : vector<64x64xf32>
    %19 = tpu.matmul %16, %18, %cst_13 {dimension_numbers = #tpu.dot_dimension_numbers<[1], [0], [0], [1], [0, 0, 1, 1], [], []>} : vector<64x32xbf16>, vector<32x64xbf16>, vector<64x64xf32> -> vector<64x64xf32>
    %20 = arith.addf %13, %19 : vector<64x64xf32>
    %21 = vector.extract_strided_slice %2 {offsets = [0, 2, 0], sizes = [8, 8, 32], strides = [1, 1, 1]} : vector<10x10x32xf32> to vector<8x8x32xf32>
    %22 = vector.shape_cast %21 : vector<8x8x32xf32> to vector<64x32xf32>
    %23 = arith.truncf %22 : vector<64x32xf32> to vector<64x32xbf16>
    %c2 = arith.constant 2 : index
    %c0_14 = arith.constant 0 : index
    %c0_15 = arith.constant 0 : index
    %24 = vector.load %arg3[%c2, %c0_14, %c0_15] : memref<9x32x64xbf16, #tpu.memory_space<vmem>>, vector<1x32x64xbf16>
    %25 = vector.shape_cast %24 : vector<1x32x64xbf16> to vector<32x64xbf16>
    %cst_16 = arith.constant dense<0.000000e+00> : vector<64x64xf32>
    %26 = tpu.matmul %23, %25, %cst_16 {dimension_numbers = #tpu.dot_dimension_numbers<[1], [0], [0], [1], [0, 0, 1, 1], [], []>} : vector<64x32xbf16>, vector<32x64xbf16>, vector<64x64xf32> -> vector<64x64xf32>
    %27 = arith.addf %20, %26 : vector<64x64xf32>
    %28 = vector.extract_strided_slice %2 {offsets = [1, 0, 0], sizes = [8, 8, 32], strides = [1, 1, 1]} : vector<10x10x32xf32> to vector<8x8x32xf32>
    %29 = vector.shape_cast %28 : vector<8x8x32xf32> to vector<64x32xf32>
    %30 = arith.truncf %29 : vector<64x32xf32> to vector<64x32xbf16>
    %c3 = arith.constant 3 : index
    %c0_17 = arith.constant 0 : index
    %c0_18 = arith.constant 0 : index
    %31 = vector.load %arg3[%c3, %c0_17, %c0_18] : memref<9x32x64xbf16, #tpu.memory_space<vmem>>, vector<1x32x64xbf16>
    %32 = vector.shape_cast %31 : vector<1x32x64xbf16> to vector<32x64xbf16>
    %cst_19 = arith.constant dense<0.000000e+00> : vector<64x64xf32>
    %33 = tpu.matmul %30, %32, %cst_19 {dimension_numbers = #tpu.dot_dimension_numbers<[1], [0], [0], [1], [0, 0, 1, 1], [], []>} : vector<64x32xbf16>, vector<32x64xbf16>, vector<64x64xf32> -> vector<64x64xf32>
    %34 = arith.addf %27, %33 : vector<64x64xf32>
    %35 = vector.extract_strided_slice %2 {offsets = [1, 1, 0], sizes = [8, 8, 32], strides = [1, 1, 1]} : vector<10x10x32xf32> to vector<8x8x32xf32>
    %36 = vector.shape_cast %35 : vector<8x8x32xf32> to vector<64x32xf32>
    %37 = arith.truncf %36 : vector<64x32xf32> to vector<64x32xbf16>
    %c4 = arith.constant 4 : index
    %c0_20 = arith.constant 0 : index
    %c0_21 = arith.constant 0 : index
    %38 = vector.load %arg3[%c4, %c0_20, %c0_21] : memref<9x32x64xbf16, #tpu.memory_space<vmem>>, vector<1x32x64xbf16>
    %39 = vector.shape_cast %38 : vector<1x32x64xbf16> to vector<32x64xbf16>
    %cst_22 = arith.constant dense<0.000000e+00> : vector<64x64xf32>
    %40 = tpu.matmul %37, %39, %cst_22 {dimension_numbers = #tpu.dot_dimension_numbers<[1], [0], [0], [1], [0, 0, 1, 1], [], []>} : vector<64x32xbf16>, vector<32x64xbf16>, vector<64x64xf32> -> vector<64x64xf32>
    %41 = arith.addf %34, %40 : vector<64x64xf32>
    %42 = vector.extract_strided_slice %2 {offsets = [1, 2, 0], sizes = [8, 8, 32], strides = [1, 1, 1]} : vector<10x10x32xf32> to vector<8x8x32xf32>
    %43 = vector.shape_cast %42 : vector<8x8x32xf32> to vector<64x32xf32>
    %44 = arith.truncf %43 : vector<64x32xf32> to vector<64x32xbf16>
    %c5 = arith.constant 5 : index
    %c0_23 = arith.constant 0 : index
    %c0_24 = arith.constant 0 : index
    %45 = vector.load %arg3[%c5, %c0_23, %c0_24] : memref<9x32x64xbf16, #tpu.memory_space<vmem>>, vector<1x32x64xbf16>
    %46 = vector.shape_cast %45 : vector<1x32x64xbf16> to vector<32x64xbf16>
    %cst_25 = arith.constant dense<0.000000e+00> : vector<64x64xf32>
    %47 = tpu.matmul %44, %46, %cst_25 {dimension_numbers = #tpu.dot_dimension_numbers<[1], [0], [0], [1], [0, 0, 1, 1], [], []>} : vector<64x32xbf16>, vector<32x64xbf16>, vector<64x64xf32> -> vector<64x64xf32>
    %48 = arith.addf %41, %47 : vector<64x64xf32>
    %49 = vector.extract_strided_slice %2 {offsets = [2, 0, 0], sizes = [8, 8, 32], strides = [1, 1, 1]} : vector<10x10x32xf32> to vector<8x8x32xf32>
    %50 = vector.shape_cast %49 : vector<8x8x32xf32> to vector<64x32xf32>
    %51 = arith.truncf %50 : vector<64x32xf32> to vector<64x32xbf16>
    %c6 = arith.constant 6 : index
    %c0_26 = arith.constant 0 : index
    %c0_27 = arith.constant 0 : index
    %52 = vector.load %arg3[%c6, %c0_26, %c0_27] : memref<9x32x64xbf16, #tpu.memory_space<vmem>>, vector<1x32x64xbf16>
    %53 = vector.shape_cast %52 : vector<1x32x64xbf16> to vector<32x64xbf16>
    %cst_28 = arith.constant dense<0.000000e+00> : vector<64x64xf32>
    %54 = tpu.matmul %51, %53, %cst_28 {dimension_numbers = #tpu.dot_dimension_numbers<[1], [0], [0], [1], [0, 0, 1, 1], [], []>} : vector<64x32xbf16>, vector<32x64xbf16>, vector<64x64xf32> -> vector<64x64xf32>
    %55 = arith.addf %48, %54 : vector<64x64xf32>
    %56 = vector.extract_strided_slice %2 {offsets = [2, 1, 0], sizes = [8, 8, 32], strides = [1, 1, 1]} : vector<10x10x32xf32> to vector<8x8x32xf32>
    %57 = vector.shape_cast %56 : vector<8x8x32xf32> to vector<64x32xf32>
    %58 = arith.truncf %57 : vector<64x32xf32> to vector<64x32xbf16>
    %c7 = arith.constant 7 : index
    %c0_29 = arith.constant 0 : index
    %c0_30 = arith.constant 0 : index
    %59 = vector.load %arg3[%c7, %c0_29, %c0_30] : memref<9x32x64xbf16, #tpu.memory_space<vmem>>, vector<1x32x64xbf16>
    %60 = vector.shape_cast %59 : vector<1x32x64xbf16> to vector<32x64xbf16>
    %cst_31 = arith.constant dense<0.000000e+00> : vector<64x64xf32>
    %61 = tpu.matmul %58, %60, %cst_31 {dimension_numbers = #tpu.dot_dimension_numbers<[1], [0], [0], [1], [0, 0, 1, 1], [], []>} : vector<64x32xbf16>, vector<32x64xbf16>, vector<64x64xf32> -> vector<64x64xf32>
    %62 = arith.addf %55, %61 : vector<64x64xf32>
    %63 = vector.extract_strided_slice %2 {offsets = [2, 2, 0], sizes = [8, 8, 32], strides = [1, 1, 1]} : vector<10x10x32xf32> to vector<8x8x32xf32>
    %64 = vector.shape_cast %63 : vector<8x8x32xf32> to vector<64x32xf32>
    %65 = arith.truncf %64 : vector<64x32xf32> to vector<64x32xbf16>
    %c8 = arith.constant 8 : index
    %c0_32 = arith.constant 0 : index
    %c0_33 = arith.constant 0 : index
    %66 = vector.load %arg3[%c8, %c0_32, %c0_33] : memref<9x32x64xbf16, #tpu.memory_space<vmem>>, vector<1x32x64xbf16>
    %67 = vector.shape_cast %66 : vector<1x32x64xbf16> to vector<32x64xbf16>
    %cst_34 = arith.constant dense<0.000000e+00> : vector<64x64xf32>
    %68 = tpu.matmul %65, %67, %cst_34 {dimension_numbers = #tpu.dot_dimension_numbers<[1], [0], [0], [1], [0, 0, 1, 1], [], []>} : vector<64x32xbf16>, vector<32x64xbf16>, vector<64x64xf32> -> vector<64x64xf32>
    %69 = arith.addf %62, %68 : vector<64x64xf32>
    %70 = vector.extract_strided_slice %5 {offsets = [0, 0, 0], sizes = [8, 8, 32], strides = [1, 1, 1]} : vector<10x10x32xf32> to vector<8x8x32xf32>
    %71 = vector.shape_cast %70 : vector<8x8x32xf32> to vector<64x32xf32>
    %72 = arith.truncf %71 : vector<64x32xf32> to vector<64x32xbf16>
    %c0_35 = arith.constant 0 : index
    %c0_36 = arith.constant 0 : index
    %c0_37 = arith.constant 0 : index
    %73 = vector.load %arg4[%c0_35, %c0_36, %c0_37] : memref<9x32x64xbf16, #tpu.memory_space<vmem>>, vector<1x32x64xbf16>
    %74 = vector.shape_cast %73 : vector<1x32x64xbf16> to vector<32x64xbf16>
    %cst_38 = arith.constant dense<0.000000e+00> : vector<64x64xf32>
    %75 = tpu.matmul %72, %74, %cst_38 {dimension_numbers = #tpu.dot_dimension_numbers<[1], [0], [0], [1], [0, 0, 1, 1], [], []>} : vector<64x32xbf16>, vector<32x64xbf16>, vector<64x64xf32> -> vector<64x64xf32>
    %76 = arith.addf %69, %75 : vector<64x64xf32>
    %77 = vector.extract_strided_slice %5 {offsets = [0, 1, 0], sizes = [8, 8, 32], strides = [1, 1, 1]} : vector<10x10x32xf32> to vector<8x8x32xf32>
    %78 = vector.shape_cast %77 : vector<8x8x32xf32> to vector<64x32xf32>
    %79 = arith.truncf %78 : vector<64x32xf32> to vector<64x32xbf16>
    %c1_39 = arith.constant 1 : index
    %c0_40 = arith.constant 0 : index
    %c0_41 = arith.constant 0 : index
    %80 = vector.load %arg4[%c1_39, %c0_40, %c0_41] : memref<9x32x64xbf16, #tpu.memory_space<vmem>>, vector<1x32x64xbf16>
    %81 = vector.shape_cast %80 : vector<1x32x64xbf16> to vector<32x64xbf16>
    %cst_42 = arith.constant dense<0.000000e+00> : vector<64x64xf32>
    %82 = tpu.matmul %79, %81, %cst_42 {dimension_numbers = #tpu.dot_dimension_numbers<[1], [0], [0], [1], [0, 0, 1, 1], [], []>} : vector<64x32xbf16>, vector<32x64xbf16>, vector<64x64xf32> -> vector<64x64xf32>
    %83 = arith.addf %76, %82 : vector<64x64xf32>
    %84 = vector.extract_strided_slice %5 {offsets = [0, 2, 0], sizes = [8, 8, 32], strides = [1, 1, 1]} : vector<10x10x32xf32> to vector<8x8x32xf32>
    %85 = vector.shape_cast %84 : vector<8x8x32xf32> to vector<64x32xf32>
    %86 = arith.truncf %85 : vector<64x32xf32> to vector<64x32xbf16>
    %c2_43 = arith.constant 2 : index
    %c0_44 = arith.constant 0 : index
    %c0_45 = arith.constant 0 : index
    %87 = vector.load %arg4[%c2_43, %c0_44, %c0_45] : memref<9x32x64xbf16, #tpu.memory_space<vmem>>, vector<1x32x64xbf16>
    %88 = vector.shape_cast %87 : vector<1x32x64xbf16> to vector<32x64xbf16>
    %cst_46 = arith.constant dense<0.000000e+00> : vector<64x64xf32>
    %89 = tpu.matmul %86, %88, %cst_46 {dimension_numbers = #tpu.dot_dimension_numbers<[1], [0], [0], [1], [0, 0, 1, 1], [], []>} : vector<64x32xbf16>, vector<32x64xbf16>, vector<64x64xf32> -> vector<64x64xf32>
    %90 = arith.addf %83, %89 : vector<64x64xf32>
    %91 = vector.extract_strided_slice %5 {offsets = [1, 0, 0], sizes = [8, 8, 32], strides = [1, 1, 1]} : vector<10x10x32xf32> to vector<8x8x32xf32>
    %92 = vector.shape_cast %91 : vector<8x8x32xf32> to vector<64x32xf32>
    %93 = arith.truncf %92 : vector<64x32xf32> to vector<64x32xbf16>
    %c3_47 = arith.constant 3 : index
    %c0_48 = arith.constant 0 : index
    %c0_49 = arith.constant 0 : index
    %94 = vector.load %arg4[%c3_47, %c0_48, %c0_49] : memref<9x32x64xbf16, #tpu.memory_space<vmem>>, vector<1x32x64xbf16>
    %95 = vector.shape_cast %94 : vector<1x32x64xbf16> to vector<32x64xbf16>
    %cst_50 = arith.constant dense<0.000000e+00> : vector<64x64xf32>
    %96 = tpu.matmul %93, %95, %cst_50 {dimension_numbers = #tpu.dot_dimension_numbers<[1], [0], [0], [1], [0, 0, 1, 1], [], []>} : vector<64x32xbf16>, vector<32x64xbf16>, vector<64x64xf32> -> vector<64x64xf32>
    %97 = arith.addf %90, %96 : vector<64x64xf32>
    %98 = vector.extract_strided_slice %5 {offsets = [1, 1, 0], sizes = [8, 8, 32], strides = [1, 1, 1]} : vector<10x10x32xf32> to vector<8x8x32xf32>
    %99 = vector.shape_cast %98 : vector<8x8x32xf32> to vector<64x32xf32>
    %100 = arith.truncf %99 : vector<64x32xf32> to vector<64x32xbf16>
    %c4_51 = arith.constant 4 : index
    %c0_52 = arith.constant 0 : index
    %c0_53 = arith.constant 0 : index
    %101 = vector.load %arg4[%c4_51, %c0_52, %c0_53] : memref<9x32x64xbf16, #tpu.memory_space<vmem>>, vector<1x32x64xbf16>
    %102 = vector.shape_cast %101 : vector<1x32x64xbf16> to vector<32x64xbf16>
    %cst_54 = arith.constant dense<0.000000e+00> : vector<64x64xf32>
    %103 = tpu.matmul %100, %102, %cst_54 {dimension_numbers = #tpu.dot_dimension_numbers<[1], [0], [0], [1], [0, 0, 1, 1], [], []>} : vector<64x32xbf16>, vector<32x64xbf16>, vector<64x64xf32> -> vector<64x64xf32>
    %104 = arith.addf %97, %103 : vector<64x64xf32>
    %105 = vector.extract_strided_slice %5 {offsets = [1, 2, 0], sizes = [8, 8, 32], strides = [1, 1, 1]} : vector<10x10x32xf32> to vector<8x8x32xf32>
    %106 = vector.shape_cast %105 : vector<8x8x32xf32> to vector<64x32xf32>
    %107 = arith.truncf %106 : vector<64x32xf32> to vector<64x32xbf16>
    %c5_55 = arith.constant 5 : index
    %c0_56 = arith.constant 0 : index
    %c0_57 = arith.constant 0 : index
    %108 = vector.load %arg4[%c5_55, %c0_56, %c0_57] : memref<9x32x64xbf16, #tpu.memory_space<vmem>>, vector<1x32x64xbf16>
    %109 = vector.shape_cast %108 : vector<1x32x64xbf16> to vector<32x64xbf16>
    %cst_58 = arith.constant dense<0.000000e+00> : vector<64x64xf32>
    %110 = tpu.matmul %107, %109, %cst_58 {dimension_numbers = #tpu.dot_dimension_numbers<[1], [0], [0], [1], [0, 0, 1, 1], [], []>} : vector<64x32xbf16>, vector<32x64xbf16>, vector<64x64xf32> -> vector<64x64xf32>
    %111 = arith.addf %104, %110 : vector<64x64xf32>
    %112 = vector.extract_strided_slice %5 {offsets = [2, 0, 0], sizes = [8, 8, 32], strides = [1, 1, 1]} : vector<10x10x32xf32> to vector<8x8x32xf32>
    %113 = vector.shape_cast %112 : vector<8x8x32xf32> to vector<64x32xf32>
    %114 = arith.truncf %113 : vector<64x32xf32> to vector<64x32xbf16>
    %c6_59 = arith.constant 6 : index
    %c0_60 = arith.constant 0 : index
    %c0_61 = arith.constant 0 : index
    %115 = vector.load %arg4[%c6_59, %c0_60, %c0_61] : memref<9x32x64xbf16, #tpu.memory_space<vmem>>, vector<1x32x64xbf16>
    %116 = vector.shape_cast %115 : vector<1x32x64xbf16> to vector<32x64xbf16>
    %cst_62 = arith.constant dense<0.000000e+00> : vector<64x64xf32>
    %117 = tpu.matmul %114, %116, %cst_62 {dimension_numbers = #tpu.dot_dimension_numbers<[1], [0], [0], [1], [0, 0, 1, 1], [], []>} : vector<64x32xbf16>, vector<32x64xbf16>, vector<64x64xf32> -> vector<64x64xf32>
    %118 = arith.addf %111, %117 : vector<64x64xf32>
    %119 = vector.extract_strided_slice %5 {offsets = [2, 1, 0], sizes = [8, 8, 32], strides = [1, 1, 1]} : vector<10x10x32xf32> to vector<8x8x32xf32>
    %120 = vector.shape_cast %119 : vector<8x8x32xf32> to vector<64x32xf32>
    %121 = arith.truncf %120 : vector<64x32xf32> to vector<64x32xbf16>
    %c7_63 = arith.constant 7 : index
    %c0_64 = arith.constant 0 : index
    %c0_65 = arith.constant 0 : index
    %122 = vector.load %arg4[%c7_63, %c0_64, %c0_65] : memref<9x32x64xbf16, #tpu.memory_space<vmem>>, vector<1x32x64xbf16>
    %123 = vector.shape_cast %122 : vector<1x32x64xbf16> to vector<32x64xbf16>
    %cst_66 = arith.constant dense<0.000000e+00> : vector<64x64xf32>
    %124 = tpu.matmul %121, %123, %cst_66 {dimension_numbers = #tpu.dot_dimension_numbers<[1], [0], [0], [1], [0, 0, 1, 1], [], []>} : vector<64x32xbf16>, vector<32x64xbf16>, vector<64x64xf32> -> vector<64x64xf32>
    %125 = arith.addf %118, %124 : vector<64x64xf32>
    %126 = vector.extract_strided_slice %5 {offsets = [2, 2, 0], sizes = [8, 8, 32], strides = [1, 1, 1]} : vector<10x10x32xf32> to vector<8x8x32xf32>
    %127 = vector.shape_cast %126 : vector<8x8x32xf32> to vector<64x32xf32>
    %128 = arith.truncf %127 : vector<64x32xf32> to vector<64x32xbf16>
    %c8_67 = arith.constant 8 : index
    %c0_68 = arith.constant 0 : index
    %c0_69 = arith.constant 0 : index
    %129 = vector.load %arg4[%c8_67, %c0_68, %c0_69] : memref<9x32x64xbf16, #tpu.memory_space<vmem>>, vector<1x32x64xbf16>
    %130 = vector.shape_cast %129 : vector<1x32x64xbf16> to vector<32x64xbf16>
    %cst_70 = arith.constant dense<0.000000e+00> : vector<64x64xf32>
    %131 = tpu.matmul %128, %130, %cst_70 {dimension_numbers = #tpu.dot_dimension_numbers<[1], [0], [0], [1], [0, 0, 1, 1], [], []>} : vector<64x32xbf16>, vector<32x64xbf16>, vector<64x64xf32> -> vector<64x64xf32>
    %132 = arith.addf %125, %131 : vector<64x64xf32>
    %c0_71 = arith.constant 0 : index
    %c0_72 = arith.constant 0 : index
    %133 = vector.load %arg5[%c0_71, %c0_72] : memref<1x64xf32, #tpu.memory_space<vmem>>, vector<1x64xf32>
    %134 = vector.broadcast %133 : vector<1x64xf32> to vector<64x64xf32>
    %135 = arith.addf %132, %134 : vector<64x64xf32>
    %136 = arith.truncf %135 : vector<64x64xf32> to vector<64x64xbf16>
    %c0_73 = arith.constant 0 : index
    %c0_74 = arith.constant 0 : index
    %c0_75 = arith.constant 0 : index
    %137 = vector.load %arg6[%c0_73, %c0_74, %c0_75] : memref<1x64x64xbf16, #tpu.memory_space<vmem>>, vector<1x64x64xbf16>
    %138 = vector.shape_cast %137 : vector<1x64x64xbf16> to vector<64x64xbf16>
    %139 = vector.shape_cast %136 : vector<64x64xbf16> to vector<1x64x64xbf16>
    tpu.vector_store %arg6[%c0_73, %c0_74, %c0_75], %139 {strides = array<i32>} : memref<1x64x64xbf16, #tpu.memory_space<vmem>>, vector<1x64x64xbf16>,
    %cst_76 = arith.constant dense<0.000000e+00> : vector<64xf32>
    %140 = vector.multi_reduction <add>, %135, %cst_76 [0] : vector<64x64xf32> to vector<64xf32>
    %141 = vector.shape_cast %140 : vector<64xf32> to vector<1x64xf32>
    %c0_77 = arith.constant 0 : index
    %c0_78 = arith.constant 0 : index
    %c0_79 = arith.constant 0 : index
    %142 = vector.load %arg7[%c0_77, %c0_78, %c0_79] : memref<1x1x64xf32, #tpu.memory_space<vmem>>, vector<1x1x64xf32>
    %143 = vector.shape_cast %142 : vector<1x1x64xf32> to vector<1x64xf32>
    %144 = vector.shape_cast %141 : vector<1x64xf32> to vector<1x1x64xf32>
    tpu.vector_store %arg7[%c0_77, %c0_78, %c0_79], %144 {strides = array<i32>} : memref<1x1x64xf32, #tpu.memory_space<vmem>>, vector<1x1x64xf32>,
    %145 = arith.mulf %135, %135 : vector<64x64xf32>
    %cst_80 = arith.constant dense<0.000000e+00> : vector<64xf32>
    %146 = vector.multi_reduction <add>, %145, %cst_80 [0] : vector<64x64xf32> to vector<64xf32>
    %147 = vector.shape_cast %146 : vector<64xf32> to vector<1x64xf32>
    %c0_81 = arith.constant 0 : index
    %c0_82 = arith.constant 0 : index
    %c0_83 = arith.constant 0 : index
    %148 = vector.load %arg8[%c0_81, %c0_82, %c0_83] : memref<1x1x64xf32, #tpu.memory_space<vmem>>, vector<1x1x64xf32>
    %149 = vector.shape_cast %148 : vector<1x1x64xf32> to vector<1x64xf32>
    %150 = vector.shape_cast %147 : vector<1x64xf32> to vector<1x1x64xf32>
    tpu.vector_store %arg8[%c0_81, %c0_82, %c0_83], %150 {strides = array<i32>} : memref<1x1x64xf32, #tpu.memory_space<vmem>>, vector<1x1x64xf32>,
    return
  }
  func.func @transform_0(%arg0: i32) -> (i32, i32, i32, i32) {
    %c0_i32 = arith.constant 0 : i32
    %c0_i32_0 = arith.constant 0 : i32
    %c0_i32_1 = arith.constant 0 : i32
    %c0_i32_2 = arith.constant 0 : i32
    return %arg0, %c0_i32, %c0_i32_0, %c0_i32_1 : i32, i32, i32, i32
  }
  func.func @transform_1(%arg0: i32) -> (i32, i32, i32, i32) {
    %c0_i32 = arith.constant 0 : i32
    %c0_i32_0 = arith.constant 0 : i32
    %c0_i32_1 = arith.constant 0 : i32
    %c0_i32_2 = arith.constant 0 : i32
    return %arg0, %c0_i32, %c0_i32_0, %c0_i32_1 : i32, i32, i32, i32
  }
  func.func @transform_2(%arg0: i32) -> (i32, i32, i32) {
    %c0_i32 = arith.constant 0 : i32
    %c0_i32_0 = arith.constant 0 : i32
    %c0_i32_1 = arith.constant 0 : i32
    %c0_i32_2 = arith.constant 0 : i32
    return %c0_i32, %c0_i32_0, %c0_i32_1 : i32, i32, i32
  }
  func.func @transform_3(%arg0: i32) -> (i32, i32, i32) {
    %c0_i32 = arith.constant 0 : i32
    %c0_i32_0 = arith.constant 0 : i32
    %c0_i32_1 = arith.constant 0 : i32
    %c0_i32_2 = arith.constant 0 : i32
    return %c0_i32, %c0_i32_0, %c0_i32_1 : i32, i32, i32
  }
  func.func @transform_4(%arg0: i32) -> (i32, i32) {
    %c0_i32 = arith.constant 0 : i32
    %c0_i32_0 = arith.constant 0 : i32
    %c0_i32_1 = arith.constant 0 : i32
    return %c0_i32, %c0_i32_0 : i32, i32
  }
  func.func @transform_5(%arg0: i32) -> (i32, i32, i32) {
    %c0_i32 = arith.constant 0 : i32
    %c0_i32_0 = arith.constant 0 : i32
    %c0_i32_1 = arith.constant 0 : i32
    return %arg0, %c0_i32, %c0_i32_0 : i32, i32, i32
  }
  func.func @transform_6(%arg0: i32) -> (i32, i32, i32) {
    %c0_i32 = arith.constant 0 : i32
    %c0_i32_0 = arith.constant 0 : i32
    %c0_i32_1 = arith.constant 0 : i32
    return %arg0, %c0_i32, %c0_i32_0 : i32, i32, i32
  }
  func.func @transform_7(%arg0: i32) -> (i32, i32, i32) {
    %c0_i32 = arith.constant 0 : i32
    %c0_i32_0 = arith.constant 0 : i32
    %c0_i32_1 = arith.constant 0 : i32
    return %arg0, %c0_i32, %c0_i32_0 : i32, i32, i32
  }
}

</mosaic_0001>

<bundles_post_ra>
// kernel: tpu_custom_call.1
= control target key start
LH: loop header
LB: loop body
LE: loop exit
PB: predicated region body
PF: predicated region fallthrough
CT: control target
= control target key end

     0   :  { %s3446_s0 = inlined_call_operand.vmem [shape: bf16[2,10,10,32], index: 0, kind: input, shape index: {}]   ;;  %s3447_s1 = inlined_call_operand.vmem [shape: bf16[2,10,10,32], index: 1, kind: input, shape index: {}]   ;;  %s3448_s2 = inlined_call_operand.vmem [shape: bf16[9,32,64], index: 2, kind: input, shape index: {}]   ;;  %s3449_s3 = inlined_call_operand.vmem [shape: bf16[9,32,64], index: 3, kind: input, shape index: {}]   ;;  %s3450_s4 = inlined_call_operand.vmem [shape: f32[1,64], index: 4, kind: input, shape index: {}]   ;;  %s3451_s5 = inlined_call_operand.hbm [shape: bf16[2,64,64], index: 5, kind: output, shape index: {0}]   ;;  %s3452_s6 = inlined_call_operand.hbm [shape: f32[2,1,64], index: 6, kind: output, shape index: {1}]   ;;  %s3453_s7 = inlined_call_operand.hbm [shape: f32[2,1,64], index: 7, kind: output, shape index: {2}]  }
   0x1   :  { %3455 = sst [smem:[#allocation9_spill]] %s3446_s0 }
   0x2   :  { %13 = vsyncpa [#allocation3], 0 }
   0x3   :  { %15 = vsyncpa [#allocation3 + $0x1], 0 }
   0x4   :  { %16 = vsyncpa [#allocation5], 0 }
   0x5   :  { %18 = vsyncpa [#allocation5 + $0x1], 0  ;;  %s2579_s24 = smov 0   ;;  %s2581_s25 = smov 0  }
   0x6   :  { %s2583_s26 = smov 0   ;;  %s2585_s27 = smov 0  }
   0x7 LB: > { %s2600_s28 = sadd.s32 4294967295, %s2535_s27   ;;  %s3454_s29 = sadd.s32 4294967294, %s2535_s27   ;;  %s2535_s27 = sphi %s2585_s27, %s3463_s27   ;;  %s2531_s26 = sphi %s2583_s26, %s3462_s26   ;;  %s2527_s25 = sphi %s2581_s25, %s3461_s25   ;;  %s2523_s24 = sphi %s2579_s24, %s3460_s24  }
   0x8   : > { %s2604_s30 = sadd.s32 1, %s2535_s27   ;;  %s146_s8 = sadd.s32 1, %s2531_s26 }
   0x9   : > { %s143_s9 = ssub.s32 %s2535_s27, %s2604_s30  ;;  %p156_p0 = scmp.ne.s32.totalorder %s2531_s26, %s2527_s25 }
   0xa   : > { %p144_p1 = scmp.eq.s32.totalorder %s143_s9, 0  ;;  %p157_p2 = scmp.eq.s32.totalorder %s2600_s28, 1 }
   0xb   : > { %p162_p3 = scmp.ne.s32.totalorder %s2527_s25, %s2523_s24  ;;  %p163_p4 = scmp.eq.s32.totalorder %s3454_s29, 1 }
   0xc   : > { %s2617_s10 = scalar_select %p144_p1, %s2531_s26, %s146_s8  }
   0xd   : > { %p2619_p5 = por %p157_p2, %p156_p0  ;;  %p2623_p6 = por %p163_p4, %p162_p3 }
   0xe   : > { %p2030_p7 = scmp.ge.s32.totalorder %s2535_s27, 1  ;;  %p258_p8 = scmp.lt.s32.totalorder %s2535_s27, 3 }
  0x10   : > { %p259_p9 = pnand %p2030_p7, %p258_p8 }
  0x11   : > { %p303_p10 = scmp.lt.s32.totalorder (!%p259_p9), %s2600_s28, 1  ;;  %s3458_s0 = sld [smem:[#allocation9_spill]] (!%p259_p9) }
  0x12   : > { %262 = sbr.rel (%p259_p9) target bundleno = 496 (0x1f0), region = 40  ;;  %s2355_s17 = sshll.u32 (!%p259_p9), %s2600_s28, 5 }
  0x13   : > { %s1870_s23 = scalar_lea.hbm (!%p259_p9), %s3451_s5, %s2355_s17  ;;  %s2433_s17 = scalar_lea.hbm (!%p259_p9), %s3451_s5, 64 }
  0x14   : > { %s1873_s8 = sshll.u32 (!%p259_p9), %s1870_s23, 4  ;;  %s1874_s8 = int_to_ptr.hbm [resolvable:$true] %s1873_s8 }
  0x15   : > { %s2427_s13 = sshra.s32 (!%p259_p9), %s1874_s8, 4  ;;  %s2428_s13 = int_to_ptr.hbm [resolvable:$true] %s2427_s13 }
  0x16   : > { %p2434_p0 = scmp.lt.s32.totalorder (!%p259_p9), %s2428_s13, %s3451_s5 }
  0x17   : > { %v2320_v0 = vld [vmem:[%s3448_s2 + $0x8] sm:$0xff]  ;;  %v2322_v1 = vld [vmem:[%s3448_s2 + $0x18] sm:$0xff]  ;;  %v2319_v2 = vld [vmem:[%s3448_s2] sm:$0xff]  ;;  %s2643_s21 = scalar_select %p303_p10, %s2600_s28, 1  ;;  %vm472_vm0 = vcmask 261120   ;;  %vm418_vm1 = vcmask 1046528  }
  0x18   : > { %2358 = vmatpush.bf16.msra.mxu3 %v2320_v0  ;;  %2356 = vmatpush.bf16.msra.mxu2 %v2322_v1  ;;  %v2321_v3 = vld [vmem:[%s3448_s2 + $0x10] sm:$0xff]  ;;  %v2324_v4 = vld [vmem:[%s3448_s2 + $0x28] sm:$0xff]  ;;  %v2326_v5 = vld [vmem:[%s3448_s2 + $0x38] sm:$0xff]  ;;  %vm567_vm2 = vcmask 1045504   ;;  %vm1787_vm3 = vcmask 519168   ;;  %vm1796_vm4 = vcmask 523264  }
  0x19   : > { %491 = vmatpush.bf16.msra.mxu0 %v2322_v1  ;;  %544 = vmatpush.bf16.msra.mxu1 %v2320_v0  ;;  %s2360_s22 = smul.u32 80, %s2643_s21  ;;  %v2328_v6 = vld [vmem:[%s3448_s2 + $0x48] sm:$0xff]  ;;  %v2330_v7 = vld [vmem:[%s3448_s2 + $0x58] sm:$0xff]  ;;  %v2323_v8 = vld [vmem:[%s3448_s2 + $0x20] sm:$0xff]  ;;  %s2429_s21 = scalar_lea.hbm %s2428_s13, 32 }
  0x1a   : > { %v2325_v12 = vld [vmem:[%s3448_s2 + $0x30] sm:$0xff]  ;;  %v2327_v24 = vld [vmem:[%s3448_s2 + $0x40] sm:$0xff]  ;;  %v2332_v52 = vld [vmem:[%s3448_s2 + $0x68] sm:$0xff]  ;;  %p2430_p11 = scmp.ne.s32.totalorder %s2428_s13, %s2429_s21  ;;  %p2435_p1 = scmp.lt.s32.totalorder %s2433_s17, %s2429_s21 }
  0x1b   : > { %s2663_s20 = scalar_lea.vmem %s3458_s0, %s2360_s22  ;;  %v2329_v29 = vld [vmem:[%s3448_s2 + $0x50] sm:$0xff]  ;;  %v2334_v57 = vld [vmem:[%s3448_s2 + $0x78] sm:$0xff]  ;;  %v2336_v58 = vld [vmem:[%s3448_s2 + $0x88] sm:$0xff]  ;;  %s2912_s14 = scalar_lea.vmem %s3447_s1, %s2360_s22 }
  0x1c   : > { %2359 = vmatpush.bf16.msra.mxu3 %v2319_v2  ;;  %2357 = vmatpush.bf16.msra.mxu2 %v2321_v3  ;;  %v322_v9 = vld [vmem:[%s2663_s20 + $0x20] sm:$0xf]  ;;  %v324_v10 = vld [vmem:[%s2663_s20 + $0x28] sm:$0xf]  ;;  %v2671_v11 = vld [vmem:[%s2663_s20 + $0x24] sm:$0x1]  ;;  %p2431_p12 = pnand %p2430_p11, %p2619_p5  ;;  %p2436_p2 = por %p2435_p1, %p2434_p0 }
  0x1d   : > { %492 = vmatpush.bf16.msra.mxu0 %v2321_v3  ;;  %545 = vmatpush.bf16.msra.mxu1 %v2319_v2  ;;  %v2676_v13 = vunpack.c.l.bf16 %v322_v9  ;;  %v2678_v14 = vunpack.c.l.bf16 %v324_v10  ;;  %v2681_v15 = vld [vmem:[%s2663_s20 + $0x2c] sm:$0x1]  ;;  %v343_v16 = vunpack.c.l.bf16 %v2671_v11  ;;  %v314_v17 = vld [vmem:[%s2663_s20] sm:$0xf]  ;;  %v2686_v18 = vld [vmem:[%s2663_s20 + $0x4] sm:$0x1] }
  0x1e   : > { %v345_v19 = vunpack.c.l.bf16 %v2681_v15  ;;  %v316_v20 = vld [vmem:[%s2663_s20 + $0x8] sm:$0xf]  ;;  %v2691_v21 = vld [vmem:[%s2663_s20 + $0xc] sm:$0x1]  ;;  %v2693_v22 = vunpack.c.l.bf16 %v314_v17  ;;  %v335_v23 = vunpack.c.l.bf16 %v2686_v18  ;;  %v326_v40 = vld [vmem:[%s2663_s20 + $0x30] sm:$0xf]  ;;  %p2432_p13 = pneg %p2431_p12 }
  0x1f   : > { %v2701_v25 = vpack.c.bf16 %v2678_v14, %v2676_v13  ;;  %v431_v26 = vrot.slane %v2676_v13, 1  ;;  %v432_v27 = vrot.slane %v343_v16, 1  ;;  %v434_v28 = vrot.slane %v2678_v14, 1  ;;  %v328_v43 = vld [vmem:[%s2663_s20 + $0x38] sm:$0xf]  ;;  %v2338_v59 = vld [vmem:[%s3449_s3 + $0x8] sm:$0xff] }
  0x20   : > { %639 = vmatpush.bf16.msrb.mxu2 %v2324_v4  ;;  %709 = vmatpush.bf16.msrb.mxu3 %v2326_v5  ;;  %v435_v30 = vrot.slane %v345_v19, 1  ;;  %v2712_v31 = vunpack.c.l.bf16 %v316_v20  ;;  %v337_v32 = vunpack.c.l.bf16 %v2691_v21  ;;  %v419_v33 = vrot.slane %v2693_v22, 1  ;;  %v2739_v44 = vld [vmem:[%s2663_s20 + $0x34] sm:$0x1]  ;;  %v2742_v45 = vld [vmem:[%s2663_s20 + $0x3c] sm:$0x1]  ;;  %p2437_p3 = pnand %p2436_p2, %p2432_p13 }
  0x21   : > { %785 = vmatpush.bf16.msrb.mxu0 %v2328_v6  ;;  %859 = vmatpush.bf16.msrb.mxu1 %v2330_v7  ;;  %v2719_v34 = vsel %vm418_vm1, %v431_v26, %v432_v27  ;;  %v420_v35 = vrot.slane %v335_v23, 1  ;;  %v318_v47 = vld [vmem:[%s2663_s20 + $0x10] sm:$0xf]  ;;  %v319_v48 = vld [vmem:[%s2663_s20 + $0x14] sm:$0x1]  ;;  %v2760_v53 = vunpack.c.l.bf16 %v326_v40  ;;  %v2762_v54 = vunpack.c.l.bf16 %v328_v43  ;;  %v2337_v43 = vld [vmem:[%s3449_s3] sm:$0xff] }
  0x22   : > { %2060 = vmatmul.msk.bf16.vlgmr.msra.gmra.mxu3 %vm472_vm0, %v2701_v25  ;;  %v2724_v36 = vsel %vm418_vm1, %v434_v28, %v435_v30  ;;  %v422_v37 = vrot.slane %v2712_v31, 1  ;;  %v423_v38 = vrot.slane %v337_v32, 1  ;;  %v394_v39 = vpack.c.bf16 %v2712_v31, %v2693_v22  ;;  %v320_v50 = vld [vmem:[%s2663_s20 + $0x18] sm:$0xf]  ;;  %v2755_v51 = vld [vmem:[%s2663_s20 + $0x1c] sm:$0x1] }
  0x23   : > { %v2734_v41 = vpack.c.bf16 %v2724_v36, %v2719_v34  ;;  %v421_v42 = vsel %vm418_vm1, %v419_v33, %v420_v35  ;;  %v347_v55 = vunpack.c.l.bf16 %v2739_v44  ;;  %v349_v56 = vunpack.c.l.bf16 %v2742_v45  ;;  %v2333_v15 = vld [vmem:[%s3448_s2 + $0x70] sm:$0xff]  ;;  %v2340_v44 = vld [vmem:[%s3449_s3 + $0x18] sm:$0xff] }
  0x24   : > { %640 = vmatpush.bf16.msrb.mxu2 %v2323_v8  ;;  %710 = vmatpush.bf16.msrb.mxu3 %v2325_v12  ;;  %v2745_v46 = vsel %vm418_vm1, %v422_v37, %v423_v38  ;;  %v338_v60 = vunpack.c.l.bf16 %v318_v47  ;;  %v339_v61 = vunpack.c.l.bf16 %v319_v48  ;;  %v2776_v62 = vunpack.c.l.bf16 %v320_v50 }
  0x25   : > { %786 = vmatpush.bf16.msrb.mxu0 %v2327_v24  ;;  %860 = vmatpush.bf16.msrb.mxu1 %v2329_v29  ;;  %v451_v49 = vpack.c.bf16 %v2745_v46, %v421_v42  ;;  %v341_v63 = vunpack.c.l.bf16 %v2755_v51  ;;  %v437_v0 = vrot.slane %v2760_v53, 1  ;;  %v438_v1 = vrot.slane %v347_v55, 1 }
  0x26   : > { %2058 = vmatmul.msk.bf16.vlgmr.msra.gmra.mxu1 %vm472_vm0, %v394_v39  ;;  %2048 = vmatmul.msk.bf16.vlgmr.msra.gmra.mxu2 %vm472_vm0, %v2734_v41  ;;  %v440_v2 = vrot.slane %v2762_v54, 1  ;;  %v441_v3 = vrot.slane %v349_v56, 1  ;;  %v425_v4 = vrot.slane %v338_v60, 1  ;;  %v426_v5 = vrot.slane %v339_v61, 1 }
  0x27   : > { %2046 = vmatmul.msk.bf16.vlgmr.msra.gmra.mxu0 %vm472_vm0, %v451_v49  ;;  %v428_v6 = vrot.slane %v2776_v62, 1  ;;  %v429_v7 = vrot.slane %v341_v63, 1  ;;  %v2788_v8 = vpack.c.bf16 %v2762_v54, %v2760_v53  ;;  %v2791_v9 = vsel %vm418_vm1, %v437_v0, %v438_v1  ;;  %v330_v0 = vld [vmem:[%s2663_s20 + $0x40] sm:$0xf]  ;;  %v331_v1 = vld [vmem:[%s2663_s20 + $0x44] sm:$0x1] }
  0x28   : > { %917 = vmatpush.bf16.msra.mxu2 %v2332_v52  ;;  %981 = vmatpush.bf16.msra.mxu3 %v2334_v57  ;;  %v2794_v10 = vsel %vm418_vm1, %v440_v2, %v441_v3  ;;  %v427_v12 = vsel %vm418_vm1, %v425_v4, %v426_v5  ;;  %v2799_v20 = vpack.c.bf16 %v2776_v62, %v338_v60  ;;  %v574_v27 = vrot.slane %v338_v60, 2  ;;  %v2346_v2 = vld [vmem:[%s3449_s3 + $0x48] sm:$0xff] }
  0x29   : > { %1043 = vmatpush.bf16.msra.mxu0 %v2336_v58  ;;  %1112 = vmatpush.bf16.msra.mxu1 %v2338_v59  ;;  %v430_v17 = vsel %vm418_vm1, %v428_v6, %v429_v7  ;;  %v2805_v24 = vpack.c.bf16 %v2794_v10, %v2791_v9  ;;  %v575_v28 = vrot.slane %v339_v61, 2  ;;  %v568_v29 = vrot.slane %v2693_v22, 2 }
  0x2a   : > { %v2807_v26 = vpack.c.bf16 %v430_v17, %v427_v12  ;;  %v569_v30 = vrot.slane %v335_v23, 2  ;;  %v571_v33 = vrot.slane %v2712_v31, 2  ;;  %v572_v35 = vrot.slane %v337_v32, 2 }
  0x2b   : > { %v670_v37 = vpack.c.bf16 %v338_v60, %v2712_v31  ;;  %v576_v38 = vsel %vm567_vm2, %v574_v27, %v575_v28  ;;  %v583_v22 = vrot.slane %v2678_v14, 2  ;;  %v584_v18 = vrot.slane %v345_v19, 2  ;;  %v2331_v31 = vld [vmem:[%s3448_s2 + $0x60] sm:$0xff] }
  0x2c   : > { %v570_v39 = vsel %vm567_vm2, %v568_v29, %v569_v30  ;;  %v573_v40 = vsel %vm567_vm2, %v571_v33, %v572_v35  ;;  %v746_v32 = vpack.c.bf16 %v427_v12, %v2745_v46  ;;  %918 = vmatpush.bf16.msra.mxu2 %v2331_v31  ;;  %v2335_v19 = vld [vmem:[%s3448_s2 + $0x80] sm:$0xff]  ;;  %v580_v46 = vrot.slane %v2676_v13, 2  ;;  %982 = vmatpush.bf16.msra.mxu3 %v2333_v15  ;;  %v356_v29 = vld [vmem:[%s2912_s14 + $0x8] sm:$0xf]  ;;  %v2339_v35 = vld [vmem:[%s3449_s3 + $0x10] sm:$0xff] }
  0x2d   : > { %v820_v42 = vpack.c.bf16 %v576_v38, %v573_v40  ;;  %v600_v23 = vpack.c.bf16 %v573_v40, %v570_v39  ;;  %v585_v21 = vsel %vm567_vm2, %v583_v22, %v584_v18  ;;  %v581_v47 = vrot.slane %v343_v16, 2  ;;  %1044 = vmatpush.bf16.msra.mxu0 %v2335_v19  ;;  %1113 = vmatpush.bf16.msra.mxu1 %v2337_v43  ;;  %v2343_v40 = vld [vmem:[%s3449_s3 + $0x30] sm:$0xff]  ;;  %v2345_v22 = vld [vmem:[%s3449_s3 + $0x40] sm:$0xff]  ;;  %v333_v31 = vld [vmem:[%s2663_s20 + $0x4c] sm:$0x1] }
  0x2e   : > { %v577_v48 = vrot.slane %v2776_v62, 2  ;;  %v578_v49 = vrot.slane %v341_v63, 2  ;;  %v671_v50 = vpack.c.bf16 %v2676_v13, %v2776_v62  ;;  %v589_v58 = vrot.slane %v2762_v54, 2  ;;  %v362_v18 = vld [vmem:[%s2912_s14 + $0x20] sm:$0xf] }
  0x2f   : > { %v582_v51 = vsel %vm567_vm2, %v580_v46, %v581_v47  ;;  %v590_v11 = vrot.slane %v349_v56, 2  ;;  %v747_v60 = vpack.c.bf16 %v2719_v34, %v430_v17  ;;  %v586_v13 = vrot.slane %v2760_v53, 2 }
  0x30   : > { %v579_v52 = vsel %vm567_vm2, %v577_v48, %v578_v49  ;;  %v587_v45 = vrot.slane %v347_v55, 2  ;;  %v672_v56 = vpack.c.bf16 %v2760_v53, %v2678_v14  ;;  %v602_v34 = vpack.c.bf16 %v585_v21, %v582_v51  ;;  %v2344_v55 = vld [vmem:[%s3449_s3 + $0x38] sm:$0xff] }
  0x31   : > { %v821_v57 = vpack.c.bf16 %v582_v51, %v579_v52  ;;  %v601_v16 = vpack.c.bf16 %v579_v52, %v576_v38  ;;  %v591_v59 = vsel %vm567_vm2, %v589_v58, %v590_v11  ;;  %v748_v63 = vpack.c.bf16 %v2791_v9, %v2724_v36  ;;  %v2342_v36 = vld [vmem:[%s3449_s3 + $0x28] sm:$0xff]  ;;  %v358_v38 = vld [vmem:[%s2912_s14 + $0x10] sm:$0xf]  ;;  %v2348_v49 = vld [vmem:[%s3449_s3 + $0x58] sm:$0xff] }
  0x32   : > { %2061 = vmatmul.msk.bf16.gmra.mxu3 %vm472_vm0, %v2788_v8  ;;  %v588_v61 = vsel %vm567_vm2, %v586_v13, %v587_v45  ;;  %v2880_v14 = vunpack.c.l.bf16 %v330_v0  ;;  %v351_v53 = vunpack.c.l.bf16 %v331_v1  ;;  %v2937_v39 = vunpack.c.l.bf16 %v358_v38  ;;  %v2350_v51 = vld [vmem:[%s3449_s3 + $0x68] sm:$0xff]  ;;  %v368_v11 = vld [vmem:[%s2912_s14 + $0x38] sm:$0xf]  ;;  %v355_v0 = vld [vmem:[%s2912_s14 + $0x4] sm:$0x1] }
  0x33   : > { %v822_v62 = vpack.c.bf16 %v588_v61, %v585_v21  ;;  %v603_v27 = vpack.c.bf16 %v591_v59, %v588_v61  ;;  %v2960_v21 = vunpack.c.l.bf16 %v362_v18  ;;  %v2992_v61 = vunpack.c.l.bf16 %v368_v11  ;;  %v357_v1 = vld [vmem:[%s2912_s14 + $0xc] sm:$0x1] }
  0x34   : > { %v816_v3 = vrot.slane %v2880_v14, 2  ;;  %v817_v4 = vrot.slane %v351_v53, 2  ;;  %v742_v5 = vrot.slane %v2880_v14, 1  ;;  %v743_v6 = vrot.slane %v351_v53, 1 }
  0x35   : > { %v673_v7 = vpack.c.bf16 %v2880_v14, %v2762_v54  ;;  %v354_v54 = vld [vmem:[%s2912_s14] sm:$0xf] }
  0x36   : > { %2059 = vmatmul.msk.bf16.gmra.mxu1 %vm472_vm0, %v2799_v20  ;;  %2049 = vmatmul.msk.bf16.gmra.mxu2 %vm472_vm0, %v2805_v24  ;;  %v2896_v9 = vsel %vm567_vm2, %v816_v3, %v817_v4  ;;  %v2899_v12 = vsel %vm418_vm1, %v742_v5, %v743_v6  ;;  %v2917_v30 = vunpack.c.l.bf16 %v354_v54  ;;  %v377_v5 = vunpack.c.l.bf16 %v357_v1  ;;  %v359_v6 = vld [vmem:[%s2912_s14 + $0x14] sm:$0x1] }
  0x37   : > { %2047 = vmatmul.msk.bf16.gmra.mxu0 %vm472_vm0, %v2807_v26  ;;  %v823_v17 = vpack.c.bf16 %v2896_v9, %v591_v59  ;;  %v749_v28 = vpack.c.bf16 %v2899_v12, %v2794_v10  ;;  %v2919_v10 = vunpack.c.l.bf16 %v356_v29 }
  0x39   : > { %v1074_v33 = vpack.c.bf16 %v2919_v10, %v2917_v30 }
  0x42   : > { %2090 = vmatmul.msk.bf16.vlgmr.msrb.gmra.mxu3 %vm472_vm0, %v670_v37  ;;  %v2341_v37 = vld [vmem:[%s3449_s3 + $0x20] sm:$0xff] }
  0x43   : > { %1332 = vmatpush.bf16.msrb.mxu3 %v2342_v36 }
  0x46   : > { %2122 = vmatmul.msk.bf16.vlgmr.msrb.gmra.mxu1 %vm472_vm0, %v820_v42  ;;  %2074 = vmatmul.msk.bf16.vlgmr.msrb.gmra.mxu2 %vm472_vm0, %v600_v23  ;;  %v364_v23 = vld [vmem:[%s2912_s14 + $0x28] sm:$0xf] }
  0x47   : > { %2106 = vmatmul.msk.bf16.vlgmr.msrb.gmra.mxu0 %vm472_vm0, %v746_v32  ;;  %1230 = vmatpush.bf16.msrb.mxu2 %v2340_v44  ;;  %v2962_v32 = vunpack.c.l.bf16 %v364_v23  ;;  %v1159_v23 = vrot.slane %v2917_v30, 1 }
  0x48   : > { %1402 = vmatpush.bf16.msrb.mxu0 %v2344_v55  ;;  %1478 = vmatpush.bf16.msrb.mxu1 %v2346_v2  ;;  %v375_v55 = vunpack.c.l.bf16 %v355_v0  ;;  %v1267_v0 = vrot.slane %v2937_v39, 2 }
  0x49   : > { %1333 = vmatpush.bf16.msrb.mxu3 %v2341_v37  ;;  %v2968_v15 = vpack.c.bf16 %v2962_v32, %v2960_v21 }
  0x4a   : > { %v1262_v54 = vrot.slane %v375_v55, 2 }
  0x4b   : > { %1231 = vmatpush.bf16.msrb.mxu2 %v2339_v35 }
  0x4c   : > { %1403 = vmatpush.bf16.msrb.mxu0 %v2343_v40  ;;  %1479 = vmatpush.bf16.msrb.mxu1 %v2345_v22  ;;  %v1165_v22 = vrot.slane %v2937_v39, 1 }
  0x52   : > { %2091 = vmatmul.msk.bf16.gmra.mxu3 %vm472_vm0, %v671_v50 }
  0x56   : > { %2123 = vmatmul.msk.bf16.gmra.mxu1 %vm472_vm0, %v821_v57  ;;  %2075 = vmatmul.msk.bf16.gmra.mxu2 %vm472_vm0, %v601_v16 }
  0x57   : > { %2107 = vmatmul.msk.bf16.gmra.mxu0 %vm472_vm0, %v747_v60 }
  0x62   : > { %2092 = vmatmul.msk.bf16.gmra.mxu3 %vm472_vm0, %v672_v56 }
  0x66   : > { %2124 = vmatmul.msk.bf16.gmra.mxu1 %vm472_vm0, %v822_v62  ;;  %2076 = vmatmul.msk.bf16.gmra.mxu2 %vm472_vm0, %v602_v34  ;;  %v2352_v62 = vld [vmem:[%s3449_s3 + $0x78] sm:$0xff] }
  0x67   : > { %2108 = vmatmul.msk.bf16.gmra.mxu0 %vm472_vm0, %v748_v63 }
  0x72   : > { %2093 = vmatmul.msk.bf16.gmra.mxu3 %vm472_vm0, %v673_v7 }
  0x76   : > { %2125 = vmatmul.msk.bf16.gmra.mxu1 %vm472_vm0, %v823_v17  ;;  %2077 = vmatmul.msk.bf16.gmra.mxu2 %vm472_vm0, %v603_v27 }
  0x77   : > { %2109 = vmatmul.msk.bf16.gmra.mxu0 %vm472_vm0, %v749_v28  ;;  %v1261_v28 = vrot.slane %v2917_v30, 2 }
  0x79   : > { %v1263_v37 = vsel %vm567_vm2, %v1261_v28, %v1262_v54 }
  0x82   : > { %2154 = vmatmul.msk.bf16.vlgmr.msra.gmra.mxu3 %vm472_vm0, %v2807_v26  ;;  %v360_v26 = vld [vmem:[%s2912_s14 + $0x18] sm:$0xf] }
  0x83   : > { %1610 = vmatpush.bf16.msra.mxu3 %v2350_v51  ;;  %v361_v51 = vld [vmem:[%s2912_s14 + $0x1c] sm:$0x1] }
  0x86   : > { %2182 = vmatmul.msk.bf16.vlgmr.msra.gmra.mxu1 %vm472_vm0, %v1074_v33  ;;  %2138 = vmatmul.msk.bf16.vlgmr.msra.gmra.mxu2 %vm472_vm0, %v2799_v20  ;;  %v2939_v20 = vunpack.c.l.bf16 %v360_v26  ;;  %v1265_v33 = vrot.slane %v377_v5, 2 }
  0x87   : > { %2170 = vmatmul.msk.bf16.vlgmr.msra.gmra.mxu0 %vm472_vm0, %v601_v16  ;;  %1552 = vmatpush.bf16.msra.mxu2 %v2348_v49 }
  0x88   : > { %v2946_v42 = vpack.c.bf16 %v2939_v20, %v2937_v39  ;;  %1674 = vmatpush.bf16.msra.mxu0 %v2352_v62 }
  0x92   : > { %2155 = vmatmul.msk.bf16.gmra.mxu3 %vm472_vm0, %v2734_v41  ;;  %v332_v41 = vld [vmem:[%s2663_s20 + $0x48] sm:$0xf] }
  0x93   : > { %v352_v43 = vunpack.c.l.bf16 %v332_v41  ;;  %v1160_v41 = vrot.slane %v375_v55, 1 }
  0x95   : > { %v1012_v13 = vrot.slane %v352_v43, 2  ;;  %v890_v4 = vpack.c.bf16 %v352_v43, %v2880_v14  ;;  %v1264_v14 = vrot.slane %v2919_v10, 2 }
  0x96   : > { %2183 = vmatmul.msk.bf16.gmra.mxu1 %vm472_vm0, %v2946_v42  ;;  %2139 = vmatmul.msk.bf16.gmra.mxu2 %vm472_vm0, %v2701_v25  ;;  %v353_v25 = vunpack.c.l.bf16 %v333_v31  ;;  %v1162_v31 = vrot.slane %v2919_v10, 1 }
  0x97   : > { %2171 = vmatmul.msk.bf16.gmra.mxu0 %vm472_vm0, %v602_v34  ;;  %v3028_v40 = vsel %vm567_vm2, %v1264_v14, %v1265_v33 }
  0x98   : > { %v951_v50 = vrot.slane %v353_v25, 1  ;;  %v1013_v45 = vrot.slane %v353_v25, 2 }
  0x9a   : > { %v1014_v53 = vsel %vm567_vm2, %v1012_v13, %v1013_v45 }
  0x9b   : > { %v1016_v7 = vpack.c.bf16 %v1014_v53, %v2896_v9  ;;  %v379_v9 = vunpack.c.l.bf16 %v359_v6 }
  0x9d   : > { %v1166_v18 = vrot.slane %v379_v9, 1  ;;  %v1268_v1 = vrot.slane %v379_v9, 2 }
  0x9f   : > { %v1167_v49 = vsel %vm418_vm1, %v1165_v22, %v1166_v18 }
  0xa2   : > { %2156 = vmatmul.msk.bf16.gmra.mxu3 %vm472_vm0, %v2805_v24  ;;  %v950_v24 = vrot.slane %v352_v43, 1 }
  0xa3   : > { %v547_v19 = vpop.f32.mrf.mxu1 }
  0xa4   : > { %v494_v46 = vpop.f32.mrf.mxu0  ;;  %v952_v16 = vsel %vm418_vm1, %v950_v24, %v951_v50  ;;  %v1161_v24 = vsel %vm418_vm1, %v1159_v23, %v1160_v41 }
  0xa5   : > { %v557_v47 = vpop.f32.mrf.mxu3  ;;  %v2974_v48 = vadd.f32 %v547_v19, %v494_v46  ;;  %v954_v63 = vpack.c.bf16 %v952_v16, %v2899_v12  ;;  %v2354_v12 = vld [vmem:[%s3449_s3 + $0x88] sm:$0xff]  ;;  %v1163_v19 = vrot.slane %v377_v5, 1  ;;  %v363_v16 = vld [vmem:[%s2912_s14 + $0x24] sm:$0x1]  ;;  %v1171_v5 = vrot.slane %v2960_v21, 1 }
  0xa6   : > { %2184 = vmatmul.msk.bf16.gmra.mxu1 %vm472_vm0, %v2968_v15  ;;  %2140 = vmatmul.msk.bf16.gmra.mxu2 %vm472_vm0, %v2788_v8  ;;  %v366_v8 = vld [vmem:[%s2912_s14 + $0x30] sm:$0xf]  ;;  %v383_v62 = vunpack.c.l.bf16 %v363_v16 }
  0xa7   : > { %2172 = vmatmul.msk.bf16.gmra.mxu0 %vm472_vm0, %v603_v27  ;;  %v2990_v56 = vunpack.c.l.bf16 %v366_v8  ;;  %1736 = vmatpush.bf16.msra.mxu1 %v2354_v12  ;;  %v1164_v50 = vsel %vm418_vm1, %v1162_v31, %v1163_v19  ;;  %v1168_v12 = vrot.slane %v2939_v20, 1 }
  0xa8   : > { %v1439_v30 = vpack.c.bf16 %v1167_v49, %v1164_v50  ;;  %v1191_v8 = vpack.c.bf16 %v1164_v50, %v1161_v24  ;;  %v1172_v6 = vrot.slane %v383_v62, 1  ;;  %v2353_v24 = vld [vmem:[%s3449_s3 + $0x80] sm:$0xff] }
  0xa9   : > { %v504_v52 = vpop.f32.mrf.mxu2  ;;  %v3005_v36 = vpack.c.bf16 %v2992_v61, %v2990_v56 }
  0xaa   : > { %v2985_v57 = vadd.f32 %v557_v47, %v504_v52  ;;  %v1293_v47 = vpack.c.bf16 %v3028_v40, %v1263_v37  ;;  %v1173_v33 = vsel %vm418_vm1, %v1171_v5, %v1172_v6  ;;  %v365_v37 = vld [vmem:[%s2912_s14 + $0x2c] sm:$0x1] }
  0xab   : > { %v549_v58 = vpop.f32.mrf.mxu1  ;;  %v385_v19 = vunpack.c.l.bf16 %v365_v37  ;;  %1737 = vmatpush.bf16.msra.mxu1 %v2353_v24  ;;  %v1365_v37 = vpack.c.bf16 %v2990_v56, %v2962_v32 }
  0xac   : > { %v496_v59 = vpop.f32.mrf.mxu0 }
  0xad   : > { %v559_v60 = vpop.f32.mrf.mxu3  ;;  %v2997_v34 = vadd.f32 %v549_v58, %v496_v59  ;;  %v381_v59 = vunpack.c.l.bf16 %v361_v51 }
  0xaf   : > { %v1271_v53 = vrot.slane %v381_v59, 2 }
  0xb1   : > { %v506_v44 = vpop.f32.mrf.mxu2 }
  0xb2   : > { %v3007_v2 = vadd.f32 %v559_v60, %v506_v44  ;;  %2157 = vmatmul.msk.bf16.gmra.mxu3 %vm472_vm0, %v954_v63  ;;  %v1363_v60 = vpack.c.bf16 %v2937_v39, %v2919_v10  ;;  %v2347_v63 = vld [vmem:[%s3449_s3 + $0x50] sm:$0xff]  ;;  %v1270_v44 = vrot.slane %v2939_v20, 2  ;;  %v2349_v10 = vld [vmem:[%s3449_s3 + $0x60] sm:$0xff]  ;;  %v3060_v39 = vsel %vm567_vm2, %v1267_v0, %v1268_v1 }
  0xb3   : > { %v552_v3 = vpop.f32.mrf.mxu1  ;;  %1553 = vmatpush.bf16.msra.mxu2 %v2347_v63  ;;  %1611 = vmatpush.bf16.msra.mxu3 %v2349_v10 }
  0xb4   : > { %v499_v17 = vpop.f32.mrf.mxu0 }
  0xb5   : > { %v562_v27 = vpop.f32.mrf.mxu3  ;;  %v3019_v29 = vadd.f32 %v552_v3, %v499_v17  ;;  %v1169_v17 = vrot.slane %v381_v59, 1 }
  0xb6   : > { %2185 = vmatmul.msk.bf16.gmra.mxu1 %vm472_vm0, %v3005_v36  ;;  %2141 = vmatmul.msk.bf16.gmra.mxu2 %vm472_vm0, %v890_v4 }
  0xb7   : > { %2173 = vmatmul.msk.bf16.gmra.mxu0 %vm472_vm0, %v1016_v7  ;;  %v3063_v7 = vsel %vm567_vm2, %v1270_v44, %v1271_v53  ;;  %v1170_v9 = vsel %vm418_vm1, %v1168_v12, %v1169_v17 }
  0xb8   : > { %v3071_v14 = vpack.c.bf16 %v3063_v7, %v3060_v39  ;;  %v1440_v22 = vpack.c.bf16 %v1173_v33, %v1170_v9  ;;  %v3081_v41 = vpack.c.bf16 %v1170_v9, %v1167_v49  ;;  %v3122_v9 = vld [vmem:[%s2912_s14 + $0x44] sm:$0x1] }
  0xb9   : > { %v509_v35 = vpop.f32.mrf.mxu2 }
  0xba   : > { %v3025_v38 = vadd.f32 %v562_v27, %v509_v35 }
  0xbb   : > { %v554_v26 = vpop.f32.mrf.mxu1 }
  0xbc   : > { %v501_v43 = vpop.f32.mrf.mxu0 }
  0xbd   : > { %v564_v25 = vpop.f32.mrf.mxu3  ;;  %v3033_v46 = vadd.f32 %v554_v26, %v501_v43  ;;  %v367_v43 = vld [vmem:[%s2912_s14 + $0x34] sm:$0x1] }
  0xc1   : > { %v511_v52 = vpop.f32.mrf.mxu2 }
  0xc2   : > { %v3040_v58 = vadd.f32 %v564_v25, %v511_v52  ;;  %2214 = vmatmul.msk.bf16.vlgmr.msrb.gmra.mxu3 %vm472_vm0, %v1293_v47  ;;  %v1364_v47 = vpack.c.bf16 %v2960_v21, %v2939_v20  ;;  %v1273_v52 = vrot.slane %v2960_v21, 2  ;;  %v1277_v20 = vrot.slane %v385_v19, 2 }
  0xc3   : > { %v862_v11 = vpop.f32.mrf.mxu1  ;;  %v1174_v21 = vrot.slane %v2962_v32, 1 }
  0xc4   : > { %v788_v13 = vpop.f32.mrf.mxu0 }
  0xc5   : > { %v712_v45 = vpop.f32.mrf.mxu3 }
  0xc6   : > { %2246 = vmatmul.msk.bf16.vlgmr.msrb.gmra.mxu1 %vm472_vm0, %v1439_v30  ;;  %2198 = vmatmul.msk.bf16.vlgmr.msrb.gmra.mxu2 %vm472_vm0, %v1191_v8  ;;  %v1274_v30 = vrot.slane %v383_v62, 2  ;;  %v1276_v8 = vrot.slane %v2962_v32, 2  ;;  %v1175_v62 = vrot.slane %v385_v19, 1 }
  0xc7   : > { %2230 = vmatmul.msk.bf16.vlgmr.msrb.gmra.mxu0 %vm472_vm0, %v1363_v60 }
  0xc8   : > { %v3100_v63 = vsel %vm567_vm2, %v1273_v52, %v1274_v30  ;;  %v3104_v0 = vsel %vm567_vm2, %v1276_v8, %v1277_v20 }
  0xc9   : > { %v642_v55 = vpop.f32.mrf.mxu2 }
  0xca   : > { %v662_v3 = vadd.f32 %v642_v55, %v2974_v48  ;;  %v2351_v48 = vld [vmem:[%s3449_s3 + $0x70] sm:$0xff] }
  0xcb   : > { %v864_v4 = vpop.f32.mrf.mxu1  ;;  %1675 = vmatpush.bf16.msra.mxu0 %v2351_v48  ;;  %v370_v48 = vld [vmem:[%s2912_s14 + $0x40] sm:$0xf] }
  0xcc   : > { %v732_v27 = vadd.f32 %v712_v45, %v662_v3  ;;  %v790_v28 = vpop.f32.mrf.mxu0  ;;  %v1176_v3 = vsel %vm418_vm1, %v1174_v21, %v1175_v62 }
  0xcd   : > { %v714_v54 = vpop.f32.mrf.mxu3  ;;  %v3115_v17 = vpack.c.bf16 %v1176_v3, %v1173_v33  ;;  %v391_v33 = vunpack.c.l.bf16 %v3122_v9 }
  0xce   : > { %v808_v35 = vadd.f32 %v788_v13, %v732_v27  ;;  %v1177_v13 = vrot.slane %v2990_v56, 1 }
  0xd0   : > { %v3076_v18 = vadd.f32 %v862_v11, %v808_v35 }
  0xd1   : > { %v644_v26 = vpop.f32.mrf.mxu2 }
  0xd2   : > { %v663_v23 = vadd.f32 %v644_v26, %v2997_v34  ;;  %2215 = vmatmul.msk.bf16.gmra.mxu3 %vm472_vm0, %v3071_v14  ;;  %v387_v34 = vunpack.c.l.bf16 %v367_v43  ;;  %v1282_v43 = vrot.slane %v2992_v61, 2 }
  0xd3   : > { %v867_v31 = vpop.f32.mrf.mxu1 }
  0xd4   : > { %v733_v25 = vadd.f32 %v714_v54, %v663_v23  ;;  %v793_v50 = vpop.f32.mrf.mxu0  ;;  %v1178_v45 = vrot.slane %v387_v34, 1  ;;  %v1280_v19 = vrot.slane %v387_v34, 2  ;;  %v1180_v34 = vrot.slane %v2992_v61, 1 }
  0xd5   : > { %v717_v51 = vpop.f32.mrf.mxu3 }
  0xd6   : > { %2247 = vmatmul.msk.bf16.gmra.mxu1 %vm472_vm0, %v1440_v22  ;;  %2199 = vmatmul.msk.bf16.gmra.mxu2 %vm472_vm0, %v3081_v41  ;;  %v809_v49 = vadd.f32 %v790_v28, %v733_v25  ;;  %v1179_v10 = vsel %vm418_vm1, %v1177_v13, %v1178_v45 }
  0xd7   : > { %2231 = vmatmul.msk.bf16.gmra.mxu0 %vm472_vm0, %v1364_v47  ;;  %v1441_v12 = vpack.c.bf16 %v1179_v10, %v1176_v3 }
  0xd8   : > { %v3095_v11 = vadd.f32 %v864_v4, %v809_v49  ;;  %v369_v4 = vld [vmem:[%s2912_s14 + $0x3c] sm:$0x1]  ;;  %v1436_v49 = vrot.slane %v391_v33, 1 }
  0xd9   : > { %v647_v16 = vpop.f32.mrf.mxu2  ;;  %v389_v54 = vunpack.c.l.bf16 %v369_v4 }
  0xda   : > { %v664_v59 = vadd.f32 %v647_v16, %v3019_v29  ;;  %v3108_v29 = vpack.c.bf16 %v3104_v0, %v3100_v63 }
  0xdb   : > { %v869_v60 = vpop.f32.mrf.mxu1  ;;  %v1283_v25 = vrot.slane %v389_v54, 2  ;;  %v1181_v30 = vrot.slane %v389_v54, 1 }
  0xdc   : > { %v734_v1 = vadd.f32 %v717_v51, %v664_v59  ;;  %v795_v44 = vpop.f32.mrf.mxu0 }
  0xdd   : > { %v719_v53 = vpop.f32.mrf.mxu3  ;;  %v1182_v13 = vsel %vm418_vm1, %v1180_v34, %v1181_v30 }
  0xde   : > { %v810_v55 = vadd.f32 %v793_v50, %v734_v1 }
  0xe0   : > { %v3113_v5 = vadd.f32 %v867_v31, %v810_v55  ;;  %v1279_v31 = vrot.slane %v2990_v56, 2  ;;  %v3145_v56 = vsel %vm567_vm2, %v1282_v43, %v1283_v25 }
  0xe1   : > { %v649_v6 = vpop.f32.mrf.mxu2 }
  0xe2   : > { %v665_v27 = vadd.f32 %v649_v6, %v3033_v46  ;;  %2216 = vmatmul.msk.bf16.gmra.mxu3 %vm472_vm0, %v3108_v29  ;;  %v3129_v46 = vunpack.c.l.bf16 %v370_v48  ;;  %v3142_v52 = vsel %vm567_vm2, %v1279_v31, %v1280_v19 }
  0xe3   : > { %v872_v28 = vpop.f32.mrf.mxu1 }
  0xe4   : > { %v735_v35 = vadd.f32 %v719_v53, %v665_v27  ;;  %v798_v26 = vpop.f32.mrf.mxu0  ;;  %v1435_v51 = vrot.slane %v3129_v46, 1  ;;  %v1366_v3 = vpack.c.bf16 %v3129_v46, %v2992_v61 }
  0xe5   : > { %v722_v22 = vpop.f32.mrf.mxu3 }
  0xe6   : > { %2248 = vmatmul.msk.bf16.gmra.mxu1 %vm472_vm0, %v1441_v12  ;;  %2200 = vmatmul.msk.bf16.gmra.mxu2 %vm472_vm0, %v3115_v17  ;;  %v811_v23 = vadd.f32 %v795_v44, %v735_v35  ;;  %v3153_v59 = vsel %vm418_vm1, %v1435_v51, %v1436_v49  ;;  %v3162_v44 = vpack.c.bf16 %v1182_v13, %v1179_v10 }
  0xe7   : > { %2232 = vmatmul.msk.bf16.gmra.mxu0 %vm472_vm0, %v1365_v37  ;;  %v1442_v62 = vpack.c.bf16 %v3153_v59, %v1182_v13 }
  0xe8   : > { %v3135_v32 = vadd.f32 %v869_v60, %v811_v23 }
  0xe9   : > { %v652_v47 = vpop.f32.mrf.mxu2 }
  0xea   : > { %v666_v24 = vadd.f32 %v652_v47, %v2985_v57  ;;  %v3150_v57 = vpack.c.bf16 %v3145_v56, %v3142_v52 }
  0xeb   : > { %v874_v50 = vpop.f32.mrf.mxu1 }
  0xec   : > { %v736_v8 = vadd.f32 %v722_v22, %v666_v24  ;;  %v800_v20 = vpop.f32.mrf.mxu0  ;;  %v1513_v22 = vpack.c.bf16 %v3060_v39, %v3028_v40 }
  0xed   : > { %v724_v16 = vpop.f32.mrf.mxu3 }
  0xee   : > { %v812_v60 = vadd.f32 %v798_v26, %v736_v8  ;;  %v1509_v8 = vrot.slane %v3129_v46, 2 }
  0xf0   : > { %v3156_v45 = vadd.f32 %v872_v28, %v812_v60 }
  0xf1   : > { %v654_v21 = vpop.f32.mrf.mxu2 }
  0xf2   : > { %v667_v1 = vadd.f32 %v654_v21, %v3007_v2  ;;  %2217 = vmatmul.msk.bf16.gmra.mxu3 %vm472_vm0, %v3150_v57 }
  0xf3   : > { %v877_v53 = vpop.f32.mrf.mxu1 }
  0xf4   : > { %v737_v55 = vadd.f32 %v724_v16, %v667_v1  ;;  %v803_v4 = vpop.f32.mrf.mxu0 }
  0xf5   : > { %v727_v6 = vpop.f32.mrf.mxu3 }
  0xf6   : > { %2249 = vmatmul.msk.bf16.gmra.mxu1 %vm472_vm0, %v1442_v62  ;;  %2201 = vmatmul.msk.bf16.gmra.mxu2 %vm472_vm0, %v3162_v44  ;;  %v813_v12 = vadd.f32 %v800_v20, %v737_v55 }
  0xf7   : > { %2233 = vmatmul.msk.bf16.gmra.mxu0 %vm472_vm0, %v1366_v3 }
  0xf8   : > { %v3170_v2 = vadd.f32 %v874_v50, %v813_v12  ;;  %v372_v12 = vld [vmem:[%s2912_s14 + $0x48] sm:$0xf] }
  0xf9   : > { %v657_v27 = vpop.f32.mrf.mxu2 }
  0xfa   : > { %v668_v10 = vadd.f32 %v657_v27, %v3025_v38  ;;  %v373_v27 = vld [vmem:[%s2912_s14 + $0x4c] sm:$0x1]  ;;  %s3284_s14 = sand.u32 1, %s2527_s25  }
  0xfb   : > { %v879_v28 = vpop.f32.mrf.mxu1  ;;  %s2031_s15 = sshll.u32 %s3284_s14, 5  ;;  %s1851_s9 = scalar_lea.sflag [#allocation3], %s3284_s14 }
  0xfc   : > { %v738_v54 = vadd.f32 %v727_v6, %v668_v10  ;;  %v805_v48 = vpop.f32.mrf.mxu0  ;;  %s3294_s16 = scalar_lea.vmem [#allocation2], %s2031_s15 }
  0xfd   : > { %v729_v35 = vpop.f32.mrf.mxu3  ;;  %s1871_s20 = sshll.u32 %s3294_s16, 4  ;;  %s3358_s20 = int_to_ptr.vmem [resolvable:$true] %s1871_s20 }
  0xfe   : > { %v814_v61 = vadd.f32 %v803_v4, %v738_v54 }
 0x100   : > { %v3173_v37 = vadd.f32 %v877_v53, %v814_v61 }
 0x101   : > { %v659_v26 = vpop.f32.mrf.mxu2 }
 0x102   : > { %v669_v23 = vadd.f32 %v659_v26, %v3040_v58  ;;  %2278 = vmatmul.msk.bf16.vlgmr.msra.gmra.mxu3 %vm472_vm0, %v2946_v42 }
 0x103   : > { %v1115_v31 = vpop.f32.mrf.mxu1 }
 0x104   : > { %v739_v19 = vadd.f32 %v729_v35, %v669_v23  ;;  %v1046_v43 = vpop.f32.mrf.mxu0 }
 0x105   : > { %v984_v38 = vpop.f32.mrf.mxu3 }
 0x106   : > { %2310 = vmatmul.msk.bf16.vlgmr.msra.gmra.mxu1 %vm472_vm0, %v3071_v14  ;;  %2262 = vmatmul.msk.bf16.vlgmr.msra.gmra.mxu2 %vm472_vm0, %v1513_v22  ;;  %v815_v25 = vadd.f32 %v805_v48, %v739_v19  ;;  %v1514_v14 = vpack.c.bf16 %v3100_v63, %v3063_v7 }
 0x107   : > { %2294 = vmatmul.msk.bf16.vlgmr.msra.gmra.mxu0 %vm472_vm0, %v3081_v41 }
 0x108   : > { %v3185_v47 = vadd.f32 %v879_v28, %v815_v25 }
 0x109   : > { %v920_v40 = vpop.f32.mrf.mxu2 }
 0x10a   : > { %v940_v58 = vadd.f32 %v920_v40, %v3076_v18  ;;  %v1510_v18 = vrot.slane %v391_v33, 2 }
 0x10b   : > { %v1117_v39 = vpop.f32.mrf.mxu1 }
 0x10c   : > { %v1004_v42 = vadd.f32 %v984_v38, %v940_v58  ;;  %v1048_v24 = vpop.f32.mrf.mxu0  ;;  %v1511_v16 = vsel %vm567_vm2, %v1509_v8, %v1510_v18 }
 0x10d   : > { %v986_v50 = vpop.f32.mrf.mxu3  ;;  %v1516_v58 = vpack.c.bf16 %v1511_v16, %v3145_v56 }
 0x10e   : > { %v1066_v51 = vadd.f32 %v1046_v43, %v1004_v42 }
 0x110   : > { %v3188_v49 = vadd.f32 %v1115_v31, %v1066_v51 }
 0x111   : > { %v922_v34 = vpop.f32.mrf.mxu2 }
 0x112   : > { %v941_v30 = vadd.f32 %v922_v34, %v3095_v11  ;;  %2279 = vmatmul.msk.bf16.gmra.mxu3 %vm472_vm0, %v2968_v15 }
 0x113   : > { %v1120_v41 = vpop.f32.mrf.mxu1 }
 0x114   : > { %v1005_v20 = vadd.f32 %v986_v50, %v941_v30  ;;  %v1051_v60 = vpop.f32.mrf.mxu0 }
 0x115   : > { %v989_v13 = vpop.f32.mrf.mxu3 }
 0x116   : > { %2311 = vmatmul.msk.bf16.gmra.mxu1 %vm472_vm0, %v3108_v29  ;;  %2263 = vmatmul.msk.bf16.gmra.mxu2 %vm472_vm0, %v1514_v14  ;;  %v1067_v7 = vadd.f32 %v1048_v24, %v1005_v20 }
 0x117   : > { %2295 = vmatmul.msk.bf16.gmra.mxu0 %vm472_vm0, %v3115_v17  ;;  %v1515_v17 = vpack.c.bf16 %v3142_v52, %v3104_v0 }
 0x118   : > { %v3204_v15 = vadd.f32 %v1117_v39, %v1067_v7 }
 0x119   : > { %v925_v11 = vpop.f32.mrf.mxu2 }
 0x11a   : > { %v942_v63 = vadd.f32 %v925_v11, %v3113_v5 }
 0x11b   : > { %v1122_v9 = vpop.f32.mrf.mxu1 }
 0x11c   : > { %v1006_v33 = vadd.f32 %v989_v13, %v942_v63  ;;  %v1053_v21 = vpop.f32.mrf.mxu0 }
 0x11d   : > { %v991_v62 = vpop.f32.mrf.mxu3 }
 0x11e   : > { %v1068_v1 = vadd.f32 %v1051_v60, %v1006_v33 }
 0x120   : > { %v3207_v53 = vadd.f32 %v1120_v41, %v1068_v1 }
 0x121   : > { %v927_v29 = vpop.f32.mrf.mxu2 }
 0x122   : > { %v943_v55 = vadd.f32 %v927_v29, %v3135_v32  ;;  %2280 = vmatmul.msk.bf16.gmra.mxu3 %vm472_vm0, %v3005_v36  ;;  %v392_v32 = vunpack.c.l.bf16 %v372_v12  ;;  %v393_v36 = vunpack.c.l.bf16 %v373_v27 }
 0x123   : > { %v1125_v3 = vpop.f32.mrf.mxu1 }
 0x124   : > { %v1007_v5 = vadd.f32 %v991_v62, %v943_v55  ;;  %v1056_v4 = vpop.f32.mrf.mxu0  ;;  %v1705_v48 = vrot.slane %v392_v32, 2  ;;  %v1706_v35 = vrot.slane %v393_v36, 2  ;;  %v1643_v22 = vrot.slane %v392_v32, 1 }
 0x125   : > { %v994_v6 = vpop.f32.mrf.mxu3  ;;  %v1644_v23 = vrot.slane %v393_v36, 1  ;;  %v1583_v31 = vpack.c.bf16 %v392_v32, %v3129_v46 }
 0x126   : > { %2312 = vmatmul.msk.bf16.gmra.mxu1 %vm472_vm0, %v3150_v57  ;;  %2264 = vmatmul.msk.bf16.gmra.mxu2 %vm472_vm0, %v1515_v17  ;;  %v1069_v10 = vadd.f32 %v1053_v21, %v1007_v5  ;;  %v1707_v19 = vsel %vm567_vm2, %v1705_v48, %v1706_v35 }
 0x127   : > { %2296 = vmatmul.msk.bf16.gmra.mxu0 %vm472_vm0, %v3162_v44  ;;  %v1645_v25 = vsel %vm418_vm1, %v1643_v22, %v1644_v23  ;;  %v1709_v40 = vpack.c.bf16 %v1707_v19, %v1511_v16 }
 0x128   : > { %v3221_v28 = vadd.f32 %v1122_v9, %v1069_v10  ;;  %v1647_v24 = vpack.c.bf16 %v1645_v25, %v3153_v59 }
 0x129   : > { %v930_v0 = vpop.f32.mrf.mxu2 }
 0x12a   : > { %v944_v52 = vadd.f32 %v930_v0, %v3156_v45 }
 0x12b   : > { %v1127_v54 = vpop.f32.mrf.mxu1 }
 0x12c   : > { %v1008_v61 = vadd.f32 %v994_v6, %v944_v52  ;;  %v1058_v57 = vpop.f32.mrf.mxu0 }
 0x12d   : > { %v996_v26 = vpop.f32.mrf.mxu3 }
 0x12e   : > { %v1070_v44 = vadd.f32 %v1056_v4, %v1008_v61 }
 0x130   : > { %v3226_v43 = vadd.f32 %v1125_v3, %v1070_v44 }
 0x131   : > { %v932_v38 = vpop.f32.mrf.mxu2 }
 0x132   : > { %v945_v45 = vadd.f32 %v932_v38, %v3170_v2  ;;  %2281 = vmatmul.msk.bf16.gmra.mxu3 %vm472_vm0, %v1583_v31 }
 0x133   : > { %v1130_v39 = vpop.f32.mrf.mxu1 }
 0x134   : > { %v1009_v42 = vadd.f32 %v996_v26, %v945_v45  ;;  %v1061_v46 = vpop.f32.mrf.mxu0 }
 0x135   : > { %v999_v50 = vpop.f32.mrf.mxu3 }
 0x136   : > { %2313 = vmatmul.msk.bf16.gmra.mxu1 %vm472_vm0, %v1709_v40  ;;  %2265 = vmatmul.msk.bf16.gmra.mxu2 %vm472_vm0, %v1516_v58  ;;  %v1071_v51 = vadd.f32 %v1058_v57, %v1009_v42 }
 0x137   : > { %2297 = vmatmul.msk.bf16.gmra.mxu0 %vm472_vm0, %v1647_v24 }
 0x138   : > { %v3236_v34 = vadd.f32 %v1127_v54, %v1071_v51 }
 0x139   : > { %v935_v2 = vpop.f32.mrf.mxu2 }
 0x13a   : > { %v946_v14 = vadd.f32 %v935_v2, %v3173_v37 }
 0x13b   : > { %v1132_v30 = vpop.f32.mrf.mxu1 }
 0x13c   : > { %v1010_v56 = vadd.f32 %v999_v50, %v946_v14  ;;  %v1063_v41 = vpop.f32.mrf.mxu0 }
 0x13d   : > { %v1001_v8 = vpop.f32.mrf.mxu3 }
 0x13e   : > { %v1072_v18 = vadd.f32 %v1061_v46, %v1010_v56 }
 0x140   : > { %v3239_v59 = vadd.f32 %v1130_v39, %v1072_v18 }
 0x141   : > { %v937_v20 = vpop.f32.mrf.mxu2 }
 0x142   : > { %v947_v16 = vadd.f32 %v937_v20, %v3185_v47 }
 0x143   : > { %v1481_v60 = vpop.f32.mrf.mxu1 }
 0x144   : > { %v1011_v13 = vadd.f32 %v1001_v8, %v947_v16  ;;  %v1405_v7 = vpop.f32.mrf.mxu0 }
 0x145   : > { %v1335_v11 = vpop.f32.mrf.mxu3 }
 0x146   : > { %v1073_v63 = vadd.f32 %v1063_v41, %v1011_v13 }
 0x148   : > { %v3242_v9 = vadd.f32 %v1132_v30, %v1073_v63 }
 0x149   : > { %v1233_v33 = vpop.f32.mrf.mxu2 }
 0x14a   : > { %v1253_v22 = vadd.f32 %v1233_v33, %v3188_v49 }
 0x14b   : > { %v1483_v21 = vpop.f32.mrf.mxu1 }
 0x14c   : > { %v1407_v37 = vpop.f32.mrf.mxu0  ;;  %v1355_v19 = vadd.f32 %v1335_v11, %v1253_v22 }
 0x14d   : > { %v1337_v62 = vpop.f32.mrf.mxu3 }
 0x14e   : > { %v1425_v40 = vadd.f32 %v1405_v7, %v1355_v19 }
 0x150   : > { %v1501_v42 = vadd.f32 %v1481_v60, %v1425_v40 }
 0x151   : > { %v1235_v1 = vpop.f32.mrf.mxu2 }
 0x152   : > { %v1254_v25 = vadd.f32 %v1235_v1, %v3204_v15  ;;  %v3289_v15 = vld [vmem:[%s3450_s4] ss:$0 sm:$0xff] }
 0x153   : > { %v3244_v29 = vpop.f32.mrf.mxu1 }
 0x154   : > { %v1410_v55 = vpop.f32.mrf.mxu0  ;;  %v1356_v39 = vadd.f32 %v1337_v62, %v1254_v25 }
 0x155   : > { %v1340_v17 = vpop.f32.mrf.mxu3 }
 0x156   : > { %v1426_v2 = vadd.f32 %v1407_v37, %v1356_v39 }
 0x158   : > { %v1502_v18 = vadd.f32 %v1483_v21, %v1426_v2 }
 0x159   : > { %v1238_v3 = vpop.f32.mrf.mxu2 }
 0x15a   : > { %v1255_v49 = vadd.f32 %v1238_v3, %v3207_v53 }
 0x15b   : > { %v3246_v5 = vpop.f32.mrf.mxu1 }
 0x15c   : > { %v3248_v47 = vpop.f32.mrf.mxu0  ;;  %v1357_v41 = vadd.f32 %v1340_v17, %v1255_v49 }
 0x15d   : > { %v1342_v4 = vpop.f32.mrf.mxu3 }
 0x15e   : > { %v1427_v63 = vadd.f32 %v1410_v55, %v1357_v41 }
 0x160   : > { %v1503_v17 = vadd.f32 %v3244_v29, %v1427_v63 }
 0x161   : > { %v1240_v6 = vpop.f32.mrf.mxu2 }
 0x162   : > { %v1256_v60 = vadd.f32 %v1240_v6, %v3221_v28 }
 0x163   : > { %v3250_v12 = vpop.f32.mrf.mxu1 }
 0x164   : > { %v3252_v27 = vpop.f32.mrf.mxu0  ;;  %v1358_v21 = vadd.f32 %v1342_v4, %v1256_v60 }
 0x165   : > { %v3254_v10 = vpop.f32.mrf.mxu3 }
 0x169   : > { %v1243_v32 = vpop.f32.mrf.mxu2 }
 0x16a   : > { %v1257_v55 = vadd.f32 %v1243_v32, %v3226_v43 }
 0x16b   : > { %v3256_v36 = vpop.f32.mrf.mxu1 }
 0x16c   : > { %v3258_v0 = vpop.f32.mrf.mxu0  ;;  %v1359_v43 = vadd.f32 %v3254_v10, %v1257_v55 }
 0x16d   : > { %v3260_v52 = vpop.f32.mrf.mxu3 }
 0x171   : > { %v3262_v54 = vpop.f32.mrf.mxu2 }
 0x173   : > { %v3264_v48 = vpop.f32.mrf.mxu1 }
 0x174   : > { %v3266_v35 = vpop.f32.mrf.mxu0 }
 0x175   : > { %v3268_v61 = vpop.f32.mrf.mxu3 }
 0x179   : > { %v3270_v57 = vpop.f32.mrf.mxu2 }
 0x17b   : > { %v3272_v26 = vpop.f32.mrf.mxu1 }
 0x17c   : > { %v3275_v23 = vpop.f32.mrf.mxu0 }
 0x17d   : > { %v3277_v31 = vpop.f32.mrf.mxu3 }
 0x181   : > { %v3279_v44 = vpop.f32.mrf.mxu2 }
 0x183   : > { %v1739_v38 = vpop.f32.mrf.mxu1 }
 0x184   : > { %v1677_v45 = vpop.f32.mrf.mxu0 }
 0x185   : > { %v1613_v58 = vpop.f32.mrf.mxu3 }
 0x189   : > { %v1555_v24 = vpop.f32.mrf.mxu2 }
 0x18a   : > { %v1575_v46 = vadd.f32 %v1555_v24, %v1501_v42 }
 0x18b   : > { %v1741_v50 = vpop.f32.mrf.mxu1 }
 0x18c   : > { %v1633_v51 = vadd.f32 %v1613_v58, %v1575_v46  ;;  %v1679_v14 = vpop.f32.mrf.mxu0 }
 0x18d   : > { %v1615_v30 = vpop.f32.mrf.mxu3 }
 0x18e   : > { %v1697_v56 = vadd.f32 %v1677_v45, %v1633_v51 }
 0x190   : > { %v1759_v8 = vadd.f32 %v1739_v38, %v1697_v56  ;;  %v1428_v38 = vadd.f32 %v3248_v47, %v1358_v21  ;;  %v1429_v56 = vadd.f32 %v3252_v27, %v1359_v43 }
 0x191   : > { %v1557_v20 = vpop.f32.mrf.mxu2 }
 0x192   : > { %v1771_v53 = vadd.f32 %v3289_v15, %v1759_v8  ;;  %v1576_v16 = vadd.f32 %v1557_v20, %v1502_v18  ;;  %v1504_v49 = vadd.f32 %v3246_v5, %v1428_v38  ;;  %v1505_v27 = vadd.f32 %v3250_v12, %v1429_v56 }
 0x193   : > { %v1744_v11 = vpop.f32.mrf.mxu1 }
 0x194   : > { %v1779_v13 = vpack.c.bf16 %v1771_v53, %v1771_v53  ;;  %v1634_v7 = vadd.f32 %v1615_v30, %v1576_v16  ;;  %v1682_v33 = vpop.f32.mrf.mxu0  ;;  %v1820_v28 = vmul.f32 %v1771_v53, %v1771_v53  ;;  %v1797_v19 = vsel %vm1796_vm4, %v1771_v53, 0.0 }
 0x195   : > { %v1618_v37 = vpop.f32.mrf.mxu3  ;;  %v1258_v30 = vadd.f32 %v3262_v54, %v3236_v34 }
 0x196   : > { %v1698_v62 = vadd.f32 %v1679_v14, %v1634_v7  ;;  %1788 = vst.msk [vmem:[%s3294_s16] sm:$0xf] %vm1787_vm3, %v1779_v13  ;;  %v1828_v42 = vsel %vm1796_vm4, %v1820_v28, 0.0 }
 0x197   : > { %v1360_v5 = vadd.f32 %v3260_v52, %v1258_v30 }
 0x198   : > { %v1760_v1 = vadd.f32 %v1741_v50, %v1698_v62 }
 0x199   : > { %v1560_v3 = vpop.f32.mrf.mxu2  ;;  %v1430_v62 = vadd.f32 %v3258_v0, %v1360_v5 }
 0x19a   : > { %v1772_v6 = vadd.f32 %v3289_v15, %v1760_v1  ;;  %v1577_v22 = vadd.f32 %v1560_v3, %v1503_v17 }
 0x19b   : > { %v1746_v50 = vpop.f32.mrf.mxu1 }
 0x19c   : > { %v1780_v25 = vpack.c.bf16 %v1772_v6, %v1772_v6  ;;  %v1798_v40 = vsel %vm1796_vm4, %v1772_v6, 0.0  ;;  %v1821_v4 = vmul.f32 %v1772_v6, %v1772_v6  ;;  %v1635_v45 = vadd.f32 %v1618_v37, %v1577_v22  ;;  %v1684_v39 = vpop.f32.mrf.mxu0 }
 0x19d   : > { %v1799_v58 = vadd.f32 %v1798_v40, %v1797_v19  ;;  %v1620_v29 = vpop.f32.mrf.mxu3  ;;  %v1259_v37 = vadd.f32 %v3270_v57, %v3239_v59  ;;  %v1506_v59 = vadd.f32 %v3256_v36, %v1430_v62  ;;  %v1260_v40 = vadd.f32 %v3279_v44, %v3242_v9 }
 0x19e   : > { %v1829_v24 = vsel %vm1796_vm4, %v1821_v4, 0.0  ;;  %v1699_v46 = vadd.f32 %v1682_v33, %v1635_v45  ;;  %1789 = vst.msk [vmem:[%s3294_s16 + $0x4] sm:$0xf] %vm1787_vm3, %v1780_v25 }
 0x19f   : > { %v1830_v32 = vadd.f32 %v1829_v24, %v1828_v42  ;;  %v1361_v12 = vadd.f32 %v3268_v61, %v1259_v37 }
 0x1a0   : > { %v1761_v47 = vadd.f32 %v1744_v11, %v1699_v46  ;;  %v1362_v46 = vadd.f32 %v3277_v31, %v1260_v40 }
 0x1a1   : > { %v1562_v51 = vpop.f32.mrf.mxu2  ;;  %v1431_v45 = vadd.f32 %v3266_v35, %v1361_v12 }
 0x1a2   : > { %v1773_v2 = vadd.f32 %v3289_v15, %v1761_v47  ;;  %v1578_v14 = vadd.f32 %v1562_v51, %v1504_v49  ;;  %v1432_v51 = vadd.f32 %v3275_v23, %v1362_v46 }
 0x1a3   : > { %v1749_v54 = vpop.f32.mrf.mxu1  ;;  %v1507_v9 = vadd.f32 %v3264_v48, %v1431_v45 }
 0x1a4   : > { %v1781_v41 = vpack.c.bf16 %v1773_v2, %v1773_v2  ;;  %v1800_v8 = vsel %vm1796_vm4, %v1773_v2, 0.0  ;;  %v1822_v18 = vmul.f32 %v1773_v2, %v1773_v2  ;;  %v1636_v10 = vadd.f32 %v1620_v29, %v1578_v14  ;;  %v1687_v7 = vpop.f32.mrf.mxu0 }
 0x1a5   : > { %v1801_v20 = vadd.f32 %v1800_v8, %v1799_v58  ;;  %v1623_v53 = vpop.f32.mrf.mxu3 }
 0x1a6   : > { %v1831_v16 = vsel %vm1796_vm4, %v1822_v18, 0.0  ;;  %v1700_v60 = vadd.f32 %v1684_v39, %v1636_v10  ;;  %1790 = vst.msk [vmem:[%s3294_s16 + $0x8] sm:$0xf] %vm1787_vm3, %v1781_v41 }
 0x1a7   : > { %v1832_v13 = vadd.f32 %v1831_v16, %v1830_v32 }
 0x1a8   : > { %v1762_v34 = vadd.f32 %v1746_v50, %v1700_v60 }
 0x1a9   : > { %v1565_v11 = vpop.f32.mrf.mxu2 }
 0x1aa   : > { %v1774_v63 = vadd.f32 %v3289_v15, %v1762_v34  ;;  %v1579_v33 = vadd.f32 %v1565_v11, %v1505_v27 }
 0x1ab   : > { %v1751_v4 = vpop.f32.mrf.mxu1 }
 0x1ac   : > { %v1782_v21 = vpack.c.bf16 %v1774_v63, %v1774_v63  ;;  %v1802_v1 = vsel %vm1796_vm4, %v1774_v63, 0.0  ;;  %v1823_v52 = vmul.f32 %v1774_v63, %v1774_v63  ;;  %v1637_v17 = vadd.f32 %v1623_v53, %v1579_v33  ;;  %v1689_v0 = vpop.f32.mrf.mxu0 }
 0x1ad   : > { %v1803_v3 = vadd.f32 %v1802_v1, %v1801_v20  ;;  %v1625_v55 = vpop.f32.mrf.mxu3  ;;  %v1508_v20 = vadd.f32 %v3272_v26, %v1432_v51 }
 0x1ae   : > { %v1833_v28 = vsel %vm1796_vm4, %v1823_v52, 0.0  ;;  %v1701_v6 = vadd.f32 %v1687_v7, %v1637_v17  ;;  %1791 = vst.msk [vmem:[%s3294_s16 + $0xc] sm:$0xf] %vm1787_vm3, %v1782_v21 }
 0x1af   : > { %v1834_v22 = vadd.f32 %v1833_v28, %v1832_v13 }
 0x1b0   : > { %v1763_v19 = vadd.f32 %v1749_v54, %v1701_v6 }
 0x1b1   : > { %v1567_v57 = vpop.f32.mrf.mxu2 }
 0x1b2   : > { %v1775_v38 = vadd.f32 %v3289_v15, %v1763_v19  ;;  %v1580_v25 = vadd.f32 %v1567_v57, %v1506_v59 }
 0x1b3   : > { %v1754_v41 = vpop.f32.mrf.mxu1 }
 0x1b4   : > { %v1783_v58 = vpack.c.bf16 %v1775_v38, %v1775_v38  ;;  %v1804_v61 = vsel %vm1796_vm4, %v1775_v38, 0.0  ;;  %v1824_v39 = vmul.f32 %v1775_v38, %v1775_v38  ;;  %v1638_v29 = vadd.f32 %v1625_v55, %v1580_v25  ;;  %v1692_v49 = vpop.f32.mrf.mxu0 }
 0x1b5   : > { %v1805_v42 = vadd.f32 %v1804_v61, %v1803_v3  ;;  %v1628_v44 = vpop.f32.mrf.mxu3 }
 0x1b6   : > { %v1835_v24 = vsel %vm1796_vm4, %v1824_v39, 0.0  ;;  %v1702_v36 = vadd.f32 %v1689_v0, %v1638_v29  ;;  %1792 = vst.msk [vmem:[%s3294_s16 + $0x10] sm:$0xf] %vm1787_vm3, %v1783_v58 }
 0x1b7   : > { %v1836_v43 = vadd.f32 %v1835_v24, %v1834_v22 }
 0x1b8   : > { %v1764_v32 = vadd.f32 %v1751_v4, %v1702_v36 }
 0x1b9   : > { %v1570_v35 = vpop.f32.mrf.mxu2 }
 0x1ba   : > { %v1776_v50 = vadd.f32 %v3289_v15, %v1764_v32  ;;  %v1581_v47 = vadd.f32 %v1570_v35, %v1507_v9 }
 0x1bb   : > { %v1756_v33 = vpop.f32.mrf.mxu1 }
 0x1bc   : > { %v1784_v2 = vpack.c.bf16 %v1776_v50, %v1776_v50  ;;  %v1806_v14 = vsel %vm1796_vm4, %v1776_v50, 0.0  ;;  %v1825_v30 = vmul.f32 %v1776_v50, %v1776_v50  ;;  %v1639_v56 = vadd.f32 %v1628_v44, %v1581_v47  ;;  %v1694_v54 = vpop.f32.mrf.mxu0 }
 0x1bd   : > { %v1807_v31 = vadd.f32 %v1806_v14, %v1805_v42  ;;  %v1630_v60 = vpop.f32.mrf.mxu3 }
 0x1be   : > { %v1837_v8 = vsel %vm1796_vm4, %v1825_v30, 0.0  ;;  %v1703_v18 = vadd.f32 %v1692_v49, %v1639_v56  ;;  %1793 = vst.msk [vmem:[%s3294_s16 + $0x14] sm:$0xf] %vm1787_vm3, %v1784_v2 }
 0x1bf   : > { %v1838_v48 = vadd.f32 %v1837_v8, %v1836_v43 }
 0x1c0   : > { %v1765_v10 = vadd.f32 %v1754_v41, %v1703_v18 }
 0x1c1   : > { %v1572_v53 = vpop.f32.mrf.mxu2 }
 0x1c2   : > { %v1777_v23 = vadd.f32 %v3289_v15, %v1765_v10  ;;  %v1582_v16 = vadd.f32 %v1572_v53, %v1508_v20 }
 0x1c4   : > { %v1785_v5 = vpack.c.bf16 %v1777_v23, %v1777_v23  ;;  %v1808_v13 = vsel %vm1796_vm4, %v1777_v23, 0.0  ;;  %v1826_v7 = vmul.f32 %v1777_v23, %v1777_v23  ;;  %v1640_v34 = vadd.f32 %v1630_v60, %v1582_v16 }
 0x1c5   : > { %v1809_v27 = vadd.f32 %v1808_v13, %v1807_v31 }
 0x1c6   : > { %v1839_v11 = vsel %vm1796_vm4, %v1826_v7, 0.0  ;;  %v1704_v63 = vadd.f32 %v1694_v54, %v1640_v34  ;;  %1794 = vst.msk [vmem:[%s3294_s16 + $0x18] sm:$0xf] %vm1787_vm3, %v1785_v5 }
 0x1c7   : > { %v1840_v26 = vadd.f32 %v1839_v11, %v1838_v48 }
 0x1c8   : > { %v1766_v37 = vadd.f32 %v1756_v33, %v1704_v63 }
 0x1ca   : > { %v1778_v62 = vadd.f32 %v3289_v15, %v1766_v37 }
 0x1cc   : > { %v1786_v21 = vpack.c.bf16 %v1778_v62, %v1778_v62  ;;  %v1810_v1 = vsel %vm1796_vm4, %v1778_v62, 0.0  ;;  %v1827_v52 = vmul.f32 %v1778_v62, %v1778_v62 }
 0x1cd   : > { %v1811_v17 = vadd.f32 %v1810_v1, %v1809_v27 }
 0x1ce   : > { %v1841_v3 = vsel %vm1796_vm4, %v1827_v52, 0.0  ;;  %1795 = vst.msk [vmem:[%s3294_s16 + $0x1c] sm:$0xf] %vm1787_vm3, %v1786_v21 }
 0x1cf   : > { %v1842_v28 = vadd.f32 %v1841_v3, %v1840_v26  ;;  %v1812_v6 = vrot.slane %v1811_v17, 4 }
 0x1d0   : > { %2440 = shalt.err (!%p2437_p3)
}
 0x1d1   : > { %s2537_s16 = smov 64   ;;  %s2538_s23 = smov 4   ;;  %v1813_v15 = vadd.f32 %v1812_v6, %v1811_v17  ;;  %v1843_v12 = vrot.slane %v1842_v28, 4  ;;  %vm1818_vm5 = vcmask 516096  }
 0x1d2   : > { %2361 = dma.vmem_to_hbm [thread:$0]  (%p2619_p5), %s3358_s20, 512, %s1874_s8, %s1851_s9, %s2537_s16, %s2537_s16, %s2538_s23  }
 0x1d3   : > { %v1814_v22 = vrot.slane %v1813_v15, 2  ;;  %s1885_s21 = scalar_lea.hbm %s3452_s6, %s2600_s28  ;;  %v1844_v55 = vadd.f32 %v1843_v12, %v1842_v28  ;;  %s1855_s15 = sand.u32 1, %s2600_s28  }
 0x1d4   : > { %s1898_s19 = scalar_lea.hbm %s3453_s7, %s2600_s28  ;;  %s296_s29 = scalar_lea.vmem [#allocation4], %s3284_s14 }
 0x1d5   : > { %v1815_v19 = vadd.f32 %v1814_v22, %v1813_v15  ;;  %v1845_v59 = vrot.slane %v1844_v55, 2  ;;  %s3386_s0 = sshll.u32 %s296_s29, 4  ;;  %s3388_s20 = sshll.u32 %s1885_s21, 4  ;;  %s1888_s0 = int_to_ptr.vmem [resolvable:$true] %s3386_s0  ;;  %s1890_s20 = int_to_ptr.hbm [resolvable:$true] %s3388_s20 }
 0x1d6   : > { %s302_s8 = scalar_lea.vmem [#allocation6], %s3284_s14  ;;  %s3393_s16 = sshll.u32 %s1898_s19, 4  ;;  %s1903_s16 = int_to_ptr.hbm [resolvable:$true] %s3393_s16 }
 0x1d7   : > { %v1816_v0 = vrot.slane %v1815_v19, 1  ;;  %v1846_v57 = vadd.f32 %v1845_v59, %v1844_v55  ;;  %s3391_s9 = sshll.u32 %s302_s8, 4  ;;  %s1856_s28 = scalar_lea.sflag [#allocation5], %s1855_s15  ;;  %s1901_s9 = int_to_ptr.vmem [resolvable:$true] %s3391_s9 }
 0x1d8   : > { %s2455_s23 = sshra.s32 %s1890_s20, 4  ;;  %s2461_s21 = scalar_lea.hbm %s3452_s6, 2  ;;  %s2456_s23 = int_to_ptr.hbm [resolvable:$true] %s2455_s23 }
 0x1d9   : > { %v1817_v38 = vadd.f32 %v1816_v0, %v1815_v19  ;;  %v1847_v25 = vrot.slane %v1846_v57, 1  ;;  %s2457_s14 = scalar_lea.hbm %s2456_s23, 1  ;;  %p2462_p9 = scmp.lt.s32.totalorder %s2456_s23, %s3452_s6 }
 0x1da   : > { %p2458_p4 = scmp.ne.s32.totalorder %s2456_s23, %s2457_s14  ;;  %p2463_p10 = scmp.lt.s32.totalorder %s2461_s21, %s2457_s14 }
 0x1db   : > { %1819 = vst.msk [vmem:[%s296_s29] sm:$0x1] %vm1818_vm5, %v1817_v38  ;;  %v1848_v40 = vadd.f32 %v1847_v25, %v1846_v57 }
 0x1dc   : > { %p2459_p7 = pnand %p2458_p4, %p2619_p5  ;;  %p2464_p11 = por %p2463_p10, %p2462_p9 }
 0x1de   : > { %p2460_p8 = pneg %p2459_p7 }
 0x1e0   : > { %p2465_p12 = pnand %p2464_p11, %p2460_p8 }
 0x1e2   : > { %2468 = shalt.err (!%p2465_p12)
}
 0x1e3   : > { %2362 = dma.vmem_to_hbm [thread:$0]  (%p2619_p5), %s1888_s0, 16, %s1890_s20, %s1856_s28   ;;  %1849 = vst.msk [vmem:[%s302_s8] sm:$0x1] %vm1818_vm5, %v1848_v40 }
 0x1e4   : > { %s2483_s29 = sshra.s32 %s1903_s16, 4  ;;  %s2489_s14 = scalar_lea.hbm %s3453_s7, 2  ;;  %s2484_s29 = int_to_ptr.hbm [resolvable:$true] %s2483_s29 }
 0x1e5   : > { %s2485_s15 = scalar_lea.hbm %s2484_s29, 1  ;;  %p2490_p2 = scmp.lt.s32.totalorder %s2484_s29, %s3453_s7 }
 0x1e6   : > { %p2486_p13 = scmp.ne.s32.totalorder %s2484_s29, %s2485_s15  ;;  %p2491_p3 = scmp.lt.s32.totalorder %s2489_s14, %s2485_s15 }
 0x1e8   : > { %p2487_p0 = pnand %p2486_p13, %p2619_p5  ;;  %p2492_p4 = por %p2491_p3, %p2490_p2 }
 0x1ea   : > { %p2488_p1 = pneg %p2487_p0 }
 0x1ec   : > { %p2493_p7 = pnand %p2492_p4, %p2488_p1 }
 0x1ee   : > { %2496 = shalt.err (!%p2493_p7)
}
 0x1ef   : > { %2363 = dma.vmem_to_hbm [thread:$0]  (%p2619_p5), %s1901_s9, 16, %s1903_s16, %s1856_s28  }
 0x1f0 PF: > { %p2377_p8 = scmp.ge.s32.totalorder %s2535_s27, 2  ;;  %s1914_s0 = sand.u32 1, %s2523_s24  }
 0x1f1   : > { %s1915_s20 = scalar_lea.sflag [#allocation3], %s1914_s0 }
 0x1f2   : > { %p2368_p9 = pnand %p2377_p8, %p2623_p6 }
 0x1f4   : > { %p2369_p10 = pneg %p2368_p9 }
 0x1f6   : > { %2514 = dma.done.wait (%p2369_p10), %s1915_s20, 512  }
 0x1f7   : > { %2516 = vsyncadd (%p2369_p10), %s1915_s20, 4294966784  ;;  %s3459_s8 = sadd.s32 4294967294, %s2535_s27  }
 0x1f8   : > { %s1924_s11 = sand.u32 1, %s3459_s8  }
 0x1f9   : > { %s1925_s21 = scalar_lea.sflag [#allocation5], %s1924_s11 }
 0x1fa   : > { %2518 = dma.done.wait (%p2369_p10), %s1925_s21, 32  }
 0x1fb   : > { %2520 = vsyncadd (%p2369_p10), %s1925_s21, 4294967264  ;;  %p21_p5 = scmp.ge.s32.totalorder %s2604_s30, 4   ;;  %s3460_s24 = smov %s2527_s25 }
 0x1fc   : > { %s3461_s25 = smov %s2531_s26  ;;  %s3462_s26 = smov %s2617_s10 }
 0x1fd   : > { %s3463_s27 = smov %s2604_s30  ;;  %23 = sbr.rel (!%p21_p5) target bundleno = 7 (0x7), region = 126 }
 0x202   :  { %1939 = vsyncpa [#allocation3], 1 }
 0x203   :  { %1941 = vsyncpa [#allocation3 + $0x1], 1 }
 0x204   :  { %1942 = vsyncpa [#allocation5], 1 }
 0x205   :  { %1944 = vsyncpa [#allocation5 + $0x1], 1 }

</bundles_post_ra>
